<compile_context>
chip_gen: v5e
topology: v5e:2x2
jax: 0.10.0
libtpu: 0.0.40
codegen_flags: <defaults>
</compile_context>

<pallas_src>
import math

import jax
import jax.numpy as jnp
import numpy as np
from jax.experimental import pallas as pl
from jax.experimental.pallas import tpu as pltpu


# ----------------------------------------------------------------------------- config
HIDDEN = 64
N_HEAD = 4
H2 = HIDDEN // 2            # per-head hidden size / per-block output size (32)
CH = N_HEAD * H2            # concatenated head width inside a MHAT block (128)
GLO_SIZE = 28
OBS_SIZE = 550 + GLO_SIZE   # 578

# entity layout from NNBase._forward_gru:  (start, end, n_entities, k_size)
_BLOCKS = (
    (0, 150, 10, 15),       # ball
    (150, 185, 5, 7),       # food
    (185, 210, 5, 5),       # virus
    (210, 360, 10, 15),     # oppo
    (360, 510, 10, 15),     # ptnr
)
_BLOCK_NAMES = ("b", "f", "v", "o", "p")
# obs[:, 510:550] are entity masks — MHAT2.forward forces mask = None, so ignored.

_SLAB_W = 9 * CH            # 1152 lanes: bias/LN/misc slab width


# ----------------------------------------------------------------------------- kernel
def make_policy_kernel(tb):
    """Fused forward for a batch tile of `tb` rows."""
    scale = 1.0 / math.sqrt(H2)

    def attn_group(ent, w, hp, hpt, bias_row, nblk, n_ent):
        # ent: (tb*n_ent, kin+28) flat entities with the batch query input appended.
        # w  : (kin+28, 3*nblk*128) -> output lanes [kk_0..kk_nblk | vv_... | q_...]
        ch = nblk * CH
        ne = tb * n_ent
        kvq = jnp.dot(ent, w, preferred_element_type=jnp.float32) + bias_row
        kk = kvq[:, 0:ch]
        vv = kvq[:, ch:2 * ch]
        qr = kvq[:, 2 * ch:3 * ch]                       # query replicated per entity row
        # per-head scores via head-pool matmul (lane d belongs to head d // 32)
        s = jnp.dot(qr * kk, hp, preferred_element_type=jnp.float32) * scale  # (ne, nblk*4)
        s = s - jnp.max(s, keepdims=True)                # global max: overflow-safe softmax
        es = jnp.exp(s)
        elane = jnp.dot(es, hpt, preferred_element_type=jnp.float32)          # (ne, ch)
        both = jnp.concatenate([elane * vv, elane], axis=1)                   # (ne, 2*ch)
        # batch-segment sum over entities:  rt[b, r] = 1  iff  r in [b*n_ent, (b+1)*n_ent)
        rows = jax.lax.broadcasted_iota(jnp.int32, (tb, ne), 1)
        bats = jax.lax.broadcasted_iota(jnp.int32, (tb, ne), 0)
        rt = ((rows >= bats * n_ent) & (rows < (bats + 1) * n_ent)).astype(jnp.float32)
        summed = jnp.dot(rt, both, preferred_element_type=jnp.float32)        # (tb, 2*ch)
        denom = jnp.maximum(summed[:, ch:2 * ch], 1e-30)
        return summed[:, 0:ch] * pl.reciprocal(denom, approx=True)            # (tb, ch)

    def kernel(xin_ref, e10_ref, e5_ref, w10_ref, w5_ref,
               hp10_ref, hp10t_ref, hp5_ref, hp5t_ref,
               emw_ref, gruw_ref, mlpw_ref, slab_ref, out_ref):
        slab = slab_ref[...]                             # (8, 1152)
        xin = xin_ref[...]                               # (tb, 93) = [rnn | x_glo | mask]
        rnn = xin[:, 0:HIDDEN]
        me = xin[:, HIDDEN:HIDDEN + GLO_SIZE]
        msk = xin[:, HIDDEN + GLO_SIZE:HIDDEN + GLO_SIZE + 1]

        # two fused attention groups: [ball|oppo|ptnr] (E=10) and [food|virus] (E=5)
        c10 = attn_group(e10_ref[...], w10_ref[...], hp10_ref[...], hp10t_ref[...],
                         slab[0:1, :], 3, 10)            # (tb, 384)
        c5 = attn_group(e5_ref[...], w5_ref[...], hp5_ref[...], hp5t_ref[...],
                        slab[1:2, 0:6 * CH], 2, 5)       # (tb, 256)
        c_all = jnp.concatenate([c10, c5], axis=1)       # (tb, 640) order [b, o, p, f, v]

        # per-block LayerNorm (eps 1e-5) + affine + ReLU
        g_all = slab[2:3, 0:5 * CH]
        bln_all = slab[3:4, 0:5 * CH]
        parts = []
        for i in range(5):
            ci = c_all[:, i * CH:(i + 1) * CH]
            mu = jnp.mean(ci, axis=-1, keepdims=True)
            var = jnp.mean(jnp.square(ci - mu), axis=-1, keepdims=True)
            parts.append((ci - mu) * jax.lax.rsqrt(var + 1e-5))
        cn = jnp.maximum(jnp.concatenate(parts, axis=1) * g_all + bln_all, 0.0)  # (tb, 640)

        # em layer with fc_o folded in host-side:  x = relu(cn @ (wo@em_w) + me @ em_w_glo + b)
        emw = emw_ref[...]                               # (668, 64)
        x = (jnp.dot(cn, emw[0:5 * CH, :], preferred_element_type=jnp.float32)
             + jnp.dot(me, emw[5 * CH:5 * CH + GLO_SIZE, :],
                       preferred_element_type=jnp.float32)
             + slab[4:5, 0:HIDDEN])
        x = jnp.maximum(x, 0.0)                          # (tb, 64)

        # single-step PyTorch GRU; one fused matmul producing [rz_sum | gi_n | gh_n]
        h_in = rnn * msk
        xh = jnp.concatenate([x, h_in], axis=1)          # (tb, 128)
        g = (jnp.dot(xh, gruw_ref[...], preferred_element_type=jnp.float32)
             + slab[4:5, HIDDEN:HIDDEN + 4 * HIDDEN])    # (tb, 256)
        rz = jax.nn.sigmoid(g[:, 0:2 * HIDDEN])
        r = rz[:, 0:HIDDEN]
        z = rz[:, HIDDEN:2 * HIDDEN]
        n = jnp.tanh(g[:, 2 * HIDDEN:3 * HIDDEN] + r * g[:, 3 * HIDDEN:4 * HIDDEN])
        h_new = (1.0 - z) * n + z * h_in                 # (tb, 64)

        # critic|actor MLPs packed over 128 lanes; heads packed into one (128,128) matmul
        mlpw = mlpw_ref[...]                             # (320, 128)
        h1 = jnp.maximum(jnp.dot(h_new, mlpw[0:64, :],
                                 preferred_element_type=jnp.float32)
                         + slab[4:5, 320:448], 0.0)
        h2 = jnp.maximum(jnp.dot(h1, mlpw[64:192, :],
                                 preferred_element_type=jnp.float32)
                         + slab[4:5, 448:576], 0.0)
        o = jnp.dot(h2, mlpw[192:320, :],
                    preferred_element_type=jnp.float32) + slab[4:5, 576:704]

        value = o[:, 0:1]
        mean = o[:, 1:3]
        l0 = o[:, 3:4]
        l1 = o[:, 4:5]

        # deterministic distributions (mode); Gaussian mode log-prob precomputed host-side
        # TODO(synk): stochastic sampling path (dist.sample) omitted; deterministic only.
        glp = slab[4:5, 704:705]                         # -(sum logstd) - log(2*pi)
        c_idx = (l1 > l0).astype(jnp.float32)            # argmax of 2 logits
        mx = jnp.maximum(l0, l1)
        lse = mx + jnp.log(jnp.exp(l0 - mx) + jnp.exp(l1 - mx))
        alp = (mx - lse) + glp                           # total action log-prob

        # single unmasked lane-dense store: [h_new | value | mean | c_idx | alp | 0...]
        pad = jnp.zeros((tb, 2 * HIDDEN - (HIDDEN + 5)), jnp.float32)
        out_ref[...] = jnp.concatenate([h_new, value, mean, c_idx, alp, pad], axis=1)

    return kernel


# ----------------------------------------------------------------------------- params
def _orth(key, shape, gain=1.0):
    return jax.nn.initializers.orthogonal(scale=gain)(key, shape, jnp.float32)


def _init_mhat(key, k_size):
    ks = jax.random.split(key, 3 * N_HEAD + 1)
    wq = jnp.concatenate([_orth(ks[i], (GLO_SIZE, H2)) for i in range(N_HEAD)], axis=1)
    wk = jnp.concatenate([_orth(ks[N_HEAD + i], (k_size, H2)) for i in range(N_HEAD)], axis=1)
    wv = jnp.concatenate([_orth(ks[2 * N_HEAD + i], (k_size, H2)) for i in range(N_HEAD)], axis=1)
    return dict(wq=wq, bq=jnp.zeros((1, CH), jnp.float32), wk=wk, wv=wv,
                wo=_orth(ks[-1], (CH, H2)),
                g=jnp.ones((1, CH), jnp.float32), b=jnp.zeros((1, CH), jnp.float32))


def init_policy_params(key):
    g2 = float(np.sqrt(2.0))
    ks = jax.random.split(key, 16)
    p = {}
    for i, (nm, (_, _, _, ksz)) in enumerate(zip(_BLOCK_NAMES, _BLOCKS)):
        p["mhat_" + nm] = _init_mhat(ks[i], ksz)
    # em: Linear(28 + 32*5 -> 64); row blocks ordered [ball|oppo|ptnr|food|virus|glo]
    p["em_w"] = _orth(ks[5], (GLO_SIZE + H2 * 5, HIDDEN), g2)
    p["em_b"] = jnp.zeros((1, HIDDEN), jnp.float32)
    gk = jax.random.split(ks[6], 6)
    p["gru_wi"] = jnp.concatenate([_orth(gk[i], (HIDDEN, HIDDEN)) for i in range(3)], axis=1)
    p["gru_wh"] = jnp.concatenate([_orth(gk[3 + i], (HIDDEN, HIDDEN)) for i in range(3)], axis=1)
    p["gru_bi"] = jnp.zeros((1, 3 * HIDDEN), jnp.float32)
    p["gru_bh"] = jnp.zeros((1, 3 * HIDDEN), jnp.float32)
    p["wc1"] = _orth(ks[7], (HIDDEN, HIDDEN), g2)
    p["wa1"] = _orth(ks[8], (HIDDEN, HIDDEN), g2)
    p["wc2"] = _orth(ks[9], (HIDDEN, HIDDEN), g2)
    p["wa2"] = _orth(ks[10], (HIDDEN, HIDDEN), g2)
    p["wcl"] = _orth(ks[11], (HIDDEN, 1), g2)
    p["wm"] = _orth(ks[12], (HIDDEN, 2), 1.0)
    p["wl"] = _orth(ks[13], (HIDDEN, 2), 0.01)
    p["b1"] = jnp.zeros((1, 2 * HIDDEN), jnp.float32)
    p["b2"] = jnp.zeros((1, 2 * HIDDEN), jnp.float32)
    p["b3"] = jnp.zeros((1, 5), jnp.float32)
    p["logstd"] = jnp.zeros((1, 2), jnp.float32)
    return p


def pack_params(p):
    """Host-side packing of logical params into the 10 kernel weight operands."""
    def group_pack(names, ks_):
        nblk, ch, kin = len(names), len(names) * CH, sum(ks_)
        w = jnp.zeros((kin + GLO_SIZE, 3 * ch), jnp.float32)
        bias = jnp.zeros((3 * ch,), jnp.float32)
        row = 0
        for j, (nm, k) in enumerate(zip(names, ks_)):
            bp = p["mhat_" + nm]
            w = w.at[row:row + k, j * CH:(j + 1) * CH].set(bp["wk"])
            w = w.at[row:row + k, ch + j * CH:ch + (j + 1) * CH].set(bp["wv"])
            w = w.at[kin:kin + GLO_SIZE, 2 * ch + j * CH:2 * ch + (j + 1) * CH].set(bp["wq"])
            bias = bias.at[2 * ch + j * CH:2 * ch + (j + 1) * CH].set(bp["bq"][0])
            row += k
        return w, bias

    w10, bias10 = group_pack(["b", "o", "p"], [15, 15, 15])
    w5, bias5 = group_pack(["f", "v"], [7, 5])

    def head_pool(nblk):
        ch = nblk * CH
        d = np.arange(ch)
        return (d[:, None] // H2 == np.arange(nblk * N_HEAD)[None, :]).astype(np.float32)
    hp10, hp5 = head_pool(3), head_pool(2)

    # fold fc_o into em: rows of em_w ordered [ball|oppo|ptnr|food|virus|glo]
    order = ["b", "o", "p", "f", "v"]
    fwo = jnp.concatenate(
        [p["mhat_" + nm]["wo"] @ p["em_w"][j * H2:(j + 1) * H2, :]
         for j, nm in enumerate(order)], axis=0)                      # (640, 64)
    em_fused = jnp.concatenate([fwo, p["em_w"][5 * H2:, :]], axis=0)  # (668, 64)

    g_all = jnp.concatenate([p["mhat_" + nm]["g"] for nm in order], axis=1)
    b_all = jnp.concatenate([p["mhat_" + nm]["b"] for nm in order], axis=1)

    # GRU: one (128,256) matrix producing [rz_sum | gi_n | gh_n] from [x | h_in]
    gw = jnp.zeros((2 * HIDDEN, 4 * HIDDEN), jnp.float32)
    gw = gw.at[0:HIDDEN, 0:2 * HIDDEN].set(p["gru_wi"][:, 0:2 * HIDDEN])
    gw = gw.at[HIDDEN:2 * HIDDEN, 0:2 * HIDDEN].set(p["gru_wh"][:, 0:2 * HIDDEN])
    gw = gw.at[0:HIDDEN, 2 * HIDDEN:3 * HIDDEN].set(p["gru_wi"][:, 2 * HIDDEN:3 * HIDDEN])
    gw = gw.at[HIDDEN:2 * HIDDEN, 3 * HIDDEN:4 * HIDDEN].set(p["gru_wh"][:, 2 * HIDDEN:3 * HIDDEN])
    gb = jnp.concatenate([p["gru_bi"][:, 0:2 * HIDDEN] + p["gru_bh"][:, 0:2 * HIDDEN],
                          p["gru_bi"][:, 2 * HIDDEN:3 * HIDDEN],
                          p["gru_bh"][:, 2 * HIDDEN:3 * HIDDEN]], axis=1)     # (1, 256)

    # critic|actor MLPs packed along 128 lanes; heads packed into one (128,128) matrix
    w1 = jnp.concatenate([p["wc1"], p["wa1"]], axis=1)                        # (64, 128)
    w2 = jnp.zeros((2 * HIDDEN, 2 * HIDDEN), jnp.float32)
    w2 = w2.at[:HIDDEN, :HIDDEN].set(p["wc2"]).at[HIDDEN:, HIDDEN:].set(p["wa2"])
    w3 = jnp.zeros((2 * HIDDEN, 2 * HIDDEN), jnp.float32)
    w3 = w3.at[0:HIDDEN, 0:1].set(p["wcl"])
    w3 = w3.at[HIDDEN:, 1:3].set(p["wm"])
    w3 = w3.at[HIDDEN:, 3:5].set(p["wl"])
    mlp_w = jnp.concatenate([w1, w2, w3], axis=0)                             # (320, 128)

    # bias / LN / misc slab (8, 1152)
    slab = jnp.zeros((8, _SLAB_W), jnp.float32)
    slab = slab.at[0, :].set(bias10)
    slab = slab.at[1, 0:6 * CH].set(bias5)
    slab = slab.at[2, 0:5 * CH].set(g_all[0])
    slab = slab.at[3, 0:5 * CH].set(b_all[0])
    row4 = jnp.zeros((_SLAB_W,), jnp.float32)
    row4 = row4.at[0:HIDDEN].set(p["em_b"][0])
    row4 = row4.at[HIDDEN:HIDDEN + 4 * HIDDEN].set(gb[0])
    row4 = row4.at[320:448].set(p["b1"][0])
    row4 = row4.at[448:576].set(p["b2"][0])
    row4 = row4.at[576:581].set(p["b3"][0])
    glp = -(p["logstd"][0, 0] + p["logstd"][0, 1]) - jnp.log(2.0 * jnp.pi)
    row4 = row4.at[704].set(glp)
    slab = slab.at[4, :].set(row4)

    return dict(w10=w10, w5=w5,
                hp10=jnp.asarray(hp10), hp10t=jnp.asarray(hp10.T),
                hp5=jnp.asarray(hp5), hp5t=jnp.asarray(hp5.T),
                em_fused=em_fused, gru_w=gw, mlp_w=mlp_w, slab=slab)


# ----------------------------------------------------------------------------- wrapper
def policy_act(packed, inputs, rnn_hxs, masks):
    """Policy.act with deterministic=True, single-step branch of _forward_gru."""
    N = inputs.shape[0]
    if N <= 8:
        tb, n_pad = N, N
    else:
        tb = 8                                  # TODO(synk): sweep larger batch tiles
        n_pad = ((N + tb - 1) // tb) * tb

    x_glo = inputs[:, 550:]
    ball = inputs[:, 0:150].reshape(N * 10, 15)
    food = inputs[:, 150:185].reshape(N * 5, 7)
    virus = inputs[:, 185:210].reshape(N * 5, 5)
    oppo = inputs[:, 210:360].reshape(N * 10, 15)
    ptnr = inputs[:, 360:510].reshape(N * 10, 15)
    e10 = jnp.concatenate([ball, oppo, ptnr, jnp.repeat(x_glo, 10, axis=0)], axis=1)
    e5 = jnp.concatenate([food, virus, jnp.repeat(x_glo, 5, axis=0)], axis=1)
    xin = jnp.concatenate([rnn_hxs, x_glo, masks], axis=1)            # (N, 93)

    def pad_rows(a, rows):
        return a if a.shape[0] == rows else jnp.pad(a, ((0, rows - a.shape[0]), (0, 0)))
    xin = pad_rows(xin, n_pad)
    e10 = pad_rows(e10, n_pad * 10)
    e5 = pad_rows(e5, n_pad * 5)

    w_args = [packed[k] for k in ("w10", "w5", "hp10", "hp10t", "hp5", "hp5t",
                                  "em_fused", "gru_w", "mlp_w", "slab")]

    def _wspec(a):
        return pl.BlockSpec(a.shape, lambda i: (0, 0))                # VMEM-resident weights

    out = pl.pallas_call(
        make_policy_kernel(tb),
        out_shape=jax.ShapeDtypeStruct((n_pad, 2 * HIDDEN), jnp.float32),
        grid=(n_pad // tb,),
        in_specs=[pl.BlockSpec((tb, xin.shape[1]), lambda i: (i, 0)),
                  pl.BlockSpec((tb * 10, e10.shape[1]), lambda i: (i, 0)),
                  pl.BlockSpec((tb * 5, e5.shape[1]), lambda i: (i, 0))]
                 + [_wspec(a) for a in w_args],
        out_specs=pl.BlockSpec((tb, 2 * HIDDEN), lambda i: (i, 0)),
        compiler_params=pltpu.CompilerParams(dimension_semantics=("parallel",)),
    )(xin, e10, e5, *w_args)

    rnn_out = out[:N, 0:HIDDEN]
    value = out[:N, HIDDEN:HIDDEN + 1]
    action = out[:N, HIDDEN + 1:HIDDEN + 4]         # [mean0, mean1, categorical_idx]
    action_log_probs = out[:N, HIDDEN + 4:HIDDEN + 5]
    return value, action, action_log_probs, rnn_out


# ----------------------------------------------------------------------------- main
if __name__ == "__main__":
    N = 2
    key = jax.random.PRNGKey(0)
    kp, kx, kh = jax.random.split(key, 3)
    params = init_policy_params(kp)
    packed = pack_params(params)

    obs = jax.random.normal(kx, (N, OBS_SIZE), jnp.float32)
    rnn_hxs = jax.random.normal(kh, (N, HIDDEN), jnp.float32)
    masks = jnp.ones((N, 1), jnp.float32)

    act_fn = jax.jit(policy_act)
    value, action, action_log_probs, new_hxs = act_fn(packed, obs, rnn_hxs, masks)
    jax.block_until_ready((value, action, action_log_probs, new_hxs))

    assert value.shape == (N, 1)
    assert action.shape == (N, 3)
    assert action_log_probs.shape == (N, 1)
    assert new_hxs.shape == (N, HIDDEN)
    assert bool(jnp.all(jnp.isfinite(value)))
    assert bool(jnp.all(jnp.isfinite(action)))
    assert bool(jnp.all(jnp.isfinite(action_log_probs)))
    assert bool(jnp.all(jnp.isfinite(new_hxs)))
    print("KERNEL_OK")
</pallas_src>

<mosaic_0001>
module attributes {stable_mosaic.version = 11 : i64} {
  func.func @kernel(%arg0: i32, %arg1: memref<2x93xf32, #tpu.memory_space<vmem>>, %arg2: memref<20x73xf32, #tpu.memory_space<vmem>>, %arg3: memref<10x40xf32, #tpu.memory_space<vmem>>, %arg4: memref<73x1152xf32, #tpu.memory_space<vmem>>, %arg5: memref<40x768xf32, #tpu.memory_space<vmem>>, %arg6: memref<384x12xf32, #tpu.memory_space<vmem>>, %arg7: memref<12x384xf32, #tpu.memory_space<vmem>>, %arg8: memref<256x8xf32, #tpu.memory_space<vmem>>, %arg9: memref<8x256xf32, #tpu.memory_space<vmem>>, %arg10: memref<668x64xf32, #tpu.memory_space<vmem>>, %arg11: memref<128x256xf32, #tpu.memory_space<vmem>>, %arg12: memref<320x128xf32, #tpu.memory_space<vmem>>, %arg13: memref<8x1152xf32, #tpu.memory_space<vmem>>, %arg14: memref<2x128xf32, #tpu.memory_space<vmem>>) attributes {dimension_semantics = [#tpu.dimension_semantics<parallel>], iteration_bounds = array<i64: 1>, scalar_prefetch = 0 : i64, scratch_operands = 0 : i64, tpu.core_type = #tpu.core_type<tc>, window_params = [{transform_indices = @transform_0, window_bounds = array<i64: 2, 93>}, {transform_indices = @transform_1, window_bounds = array<i64: 20, 73>}, {transform_indices = @transform_2, window_bounds = array<i64: 10, 40>}, {pipeline_mode = #tpu.pipeline_mode<synchronous>, transform_indices = @transform_3, window_bounds = array<i64: 73, 1152>}, {pipeline_mode = #tpu.pipeline_mode<synchronous>, transform_indices = @transform_4, window_bounds = array<i64: 40, 768>}, {pipeline_mode = #tpu.pipeline_mode<synchronous>, transform_indices = @transform_5, window_bounds = array<i64: 384, 12>}, {pipeline_mode = #tpu.pipeline_mode<synchronous>, transform_indices = @transform_6, window_bounds = array<i64: 12, 384>}, {pipeline_mode = #tpu.pipeline_mode<synchronous>, transform_indices = @transform_7, window_bounds = array<i64: 256, 8>}, {pipeline_mode = #tpu.pipeline_mode<synchronous>, transform_indices = @transform_8, window_bounds = array<i64: 8, 256>}, {pipeline_mode = #tpu.pipeline_mode<synchronous>, transform_indices = @transform_9, window_bounds = array<i64: 668, 64>}, {pipeline_mode = #tpu.pipeline_mode<synchronous>, transform_indices = @transform_10, window_bounds = array<i64: 128, 256>}, {pipeline_mode = #tpu.pipeline_mode<synchronous>, transform_indices = @transform_11, window_bounds = array<i64: 320, 128>}, {pipeline_mode = #tpu.pipeline_mode<synchronous>, transform_indices = @transform_12, window_bounds = array<i64: 8, 1152>}, {transform_indices = @transform_13, window_bounds = array<i64: 2, 128>}]} {
    %c0 = arith.constant 0 : index
    %c0_0 = arith.constant 0 : index
    %0 = vector.load %arg13[%c0, %c0_0] : memref<8x1152xf32, #tpu.memory_space<vmem>>, vector<8x1152xf32>
    %c0_1 = arith.constant 0 : index
    %c0_2 = arith.constant 0 : index
    %1 = vector.load %arg1[%c0_1, %c0_2] : memref<2x93xf32, #tpu.memory_space<vmem>>, vector<2x93xf32>
    %2 = vector.extract_strided_slice %1 {offsets = [0, 0], sizes = [2, 64], strides = [1, 1]} : vector<2x93xf32> to vector<2x64xf32>
    %3 = vector.extract_strided_slice %1 {offsets = [0, 64], sizes = [2, 28], strides = [1, 1]} : vector<2x93xf32> to vector<2x28xf32>
    %4 = vector.extract_strided_slice %1 {offsets = [0, 92], sizes = [2, 1], strides = [1, 1]} : vector<2x93xf32> to vector<2x1xf32>
    %c0_3 = arith.constant 0 : index
    %c0_4 = arith.constant 0 : index
    %5 = vector.load %arg2[%c0_3, %c0_4] : memref<20x73xf32, #tpu.memory_space<vmem>>, vector<20x73xf32>
    %c0_5 = arith.constant 0 : index
    %c0_6 = arith.constant 0 : index
    %6 = vector.load %arg4[%c0_5, %c0_6] : memref<73x1152xf32, #tpu.memory_space<vmem>>, vector<73x1152xf32>
    %c0_7 = arith.constant 0 : index
    %c0_8 = arith.constant 0 : index
    %7 = vector.load %arg6[%c0_7, %c0_8] : memref<384x12xf32, #tpu.memory_space<vmem>>, vector<384x12xf32>
    %c0_9 = arith.constant 0 : index
    %c0_10 = arith.constant 0 : index
    %8 = vector.load %arg7[%c0_9, %c0_10] : memref<12x384xf32, #tpu.memory_space<vmem>>, vector<12x384xf32>
    %9 = vector.extract_strided_slice %0 {offsets = [0, 0], sizes = [1, 1152], strides = [1, 1]} : vector<8x1152xf32> to vector<1x1152xf32>
    %cst = arith.constant dense<0.000000e+00> : vector<20x1152xf32>
    %10 = tpu.matmul %5, %6, %cst {dimension_numbers = #tpu.dot_dimension_numbers<[1], [0], [0], [1], [0, 0, 1, 1], [], []>} : vector<20x73xf32>, vector<73x1152xf32>, vector<20x1152xf32> -> vector<20x1152xf32>
    %11 = vector.broadcast %9 : vector<1x1152xf32> to vector<20x1152xf32>
    %12 = arith.addf %10, %11 : vector<20x1152xf32>
    %13 = vector.extract_strided_slice %12 {offsets = [0, 0], sizes = [20, 384], strides = [1, 1]} : vector<20x1152xf32> to vector<20x384xf32>
    %14 = vector.extract_strided_slice %12 {offsets = [0, 384], sizes = [20, 384], strides = [1, 1]} : vector<20x1152xf32> to vector<20x384xf32>
    %15 = vector.extract_strided_slice %12 {offsets = [0, 768], sizes = [20, 384], strides = [1, 1]} : vector<20x1152xf32> to vector<20x384xf32>
    %16 = arith.mulf %15, %13 : vector<20x384xf32>
    %cst_11 = arith.constant dense<0.000000e+00> : vector<20x12xf32>
    %17 = tpu.matmul %16, %7, %cst_11 {dimension_numbers = #tpu.dot_dimension_numbers<[1], [0], [0], [1], [0, 0, 1, 1], [], []>} : vector<20x384xf32>, vector<384x12xf32>, vector<20x12xf32> -> vector<20x12xf32>
    %cst_12 = arith.constant 0.176776692 : f32
    %18 = vector.broadcast %cst_12 : f32 to vector<20x12xf32>
    %19 = arith.mulf %17, %18 : vector<20x12xf32>
    %20 = vector.shape_cast %19 : vector<20x12xf32> to vector<1x20x12xf32>
    %cst_13 = arith.constant dense<0xFF800000> : vector<1xf32>
    %21 = vector.multi_reduction <maximumf>, %20, %cst_13 [1, 2] : vector<1x20x12xf32> to vector<1xf32>
    %22 = vector.shape_cast %21 : vector<1xf32> to vector<1x1x1xf32>
    %23 = vector.extract %22[0, 0, 0] : f32 from vector<1x1x1xf32>
    %24 = vector.broadcast %23 : f32 to vector<1x1xf32>
    %25 = vector.broadcast %24 : vector<1x1xf32> to vector<20x12xf32>
    %26 = arith.subf %19, %25 : vector<20x12xf32>
    %27 = math.exp %26 : vector<20x12xf32>
    %cst_14 = arith.constant dense<0.000000e+00> : vector<20x384xf32>
    %28 = tpu.matmul %27, %8, %cst_14 {dimension_numbers = #tpu.dot_dimension_numbers<[1], [0], [0], [1], [0, 0, 1, 1], [], []>} : vector<20x12xf32>, vector<12x384xf32>, vector<20x384xf32> -> vector<20x384xf32>
    %29 = arith.mulf %28, %14 : vector<20x384xf32>
    %30 = tpu.concatenate %29, %28 in 1 : vector<20x384xf32>, vector<20x384xf32> -> vector<20x768xf32>
    %31 = tpu.iota {dimensions = array<i32: 1>} : vector<2x20xi32>
    %32 = tpu.iota {dimensions = array<i32: 0>} : vector<2x20xi32>
    %c10_i32 = arith.constant 10 : i32
    %33 = vector.broadcast %c10_i32 : i32 to vector<2x20xi32>
    %34 = arith.muli %32, %33 : vector<2x20xi32>
    %35 = arith.cmpi sge, %31, %34 : vector<2x20xi32>
    %c1_i32 = arith.constant 1 : i32
    %36 = vector.broadcast %c1_i32 : i32 to vector<2x20xi32>
    %37 = arith.addi %32, %36 : vector<2x20xi32>
    %c10_i32_15 = arith.constant 10 : i32
    %38 = vector.broadcast %c10_i32_15 : i32 to vector<2x20xi32>
    %39 = arith.muli %37, %38 : vector<2x20xi32>
    %40 = arith.cmpi slt, %31, %39 : vector<2x20xi32>
    %41 = arith.andi %35, %40 : vector<2x20xi1>
    %42 = arith.extui %41 : vector<2x20xi1> to vector<2x20xi32>
    %43 = arith.sitofp %42 : vector<2x20xi32> to vector<2x20xf32>
    %cst_16 = arith.constant dense<0.000000e+00> : vector<2x768xf32>
    %44 = tpu.matmul %43, %30, %cst_16 {dimension_numbers = #tpu.dot_dimension_numbers<[1], [0], [0], [1], [0, 0, 1, 1], [], []>} : vector<2x20xf32>, vector<20x768xf32>, vector<2x768xf32> -> vector<2x768xf32>
    %45 = vector.extract_strided_slice %44 {offsets = [0, 384], sizes = [2, 384], strides = [1, 1]} : vector<2x768xf32> to vector<2x384xf32>
    %cst_17 = arith.constant 1.000000e-30 : f32
    %46 = vector.broadcast %cst_17 : f32 to vector<2x384xf32>
    %47 = arith.maximumf %45, %46 : vector<2x384xf32>
    %48 = vector.extract_strided_slice %44 {offsets = [0, 0], sizes = [2, 384], strides = [1, 1]} : vector<2x768xf32> to vector<2x384xf32>
    %49 = tpu.reciprocal %47 {approx = true} : vector<2x384xf32> -> vector<2x384xf32>
    %50 = arith.mulf %48, %49 : vector<2x384xf32>
    %c0_18 = arith.constant 0 : index
    %c0_19 = arith.constant 0 : index
    %51 = vector.load %arg3[%c0_18, %c0_19] : memref<10x40xf32, #tpu.memory_space<vmem>>, vector<10x40xf32>
    %c0_20 = arith.constant 0 : index
    %c0_21 = arith.constant 0 : index
    %52 = vector.load %arg5[%c0_20, %c0_21] : memref<40x768xf32, #tpu.memory_space<vmem>>, vector<40x768xf32>
    %c0_22 = arith.constant 0 : index
    %c0_23 = arith.constant 0 : index
    %53 = vector.load %arg8[%c0_22, %c0_23] : memref<256x8xf32, #tpu.memory_space<vmem>>, vector<256x8xf32>
    %c0_24 = arith.constant 0 : index
    %c0_25 = arith.constant 0 : index
    %54 = vector.load %arg9[%c0_24, %c0_25] : memref<8x256xf32, #tpu.memory_space<vmem>>, vector<8x256xf32>
    %55 = vector.extract_strided_slice %0 {offsets = [1, 0], sizes = [1, 768], strides = [1, 1]} : vector<8x1152xf32> to vector<1x768xf32>
    %cst_26 = arith.constant dense<0.000000e+00> : vector<10x768xf32>
    %56 = tpu.matmul %51, %52, %cst_26 {dimension_numbers = #tpu.dot_dimension_numbers<[1], [0], [0], [1], [0, 0, 1, 1], [], []>} : vector<10x40xf32>, vector<40x768xf32>, vector<10x768xf32> -> vector<10x768xf32>
    %57 = vector.broadcast %55 : vector<1x768xf32> to vector<10x768xf32>
    %58 = arith.addf %56, %57 : vector<10x768xf32>
    %59 = vector.extract_strided_slice %58 {offsets = [0, 0], sizes = [10, 256], strides = [1, 1]} : vector<10x768xf32> to vector<10x256xf32>
    %60 = vector.extract_strided_slice %58 {offsets = [0, 256], sizes = [10, 256], strides = [1, 1]} : vector<10x768xf32> to vector<10x256xf32>
    %61 = vector.extract_strided_slice %58 {offsets = [0, 512], sizes = [10, 256], strides = [1, 1]} : vector<10x768xf32> to vector<10x256xf32>
    %62 = arith.mulf %61, %59 : vector<10x256xf32>
    %cst_27 = arith.constant dense<0.000000e+00> : vector<10x8xf32>
    %63 = tpu.matmul %62, %53, %cst_27 {dimension_numbers = #tpu.dot_dimension_numbers<[1], [0], [0], [1], [0, 0, 1, 1], [], []>} : vector<10x256xf32>, vector<256x8xf32>, vector<10x8xf32> -> vector<10x8xf32>
    %cst_28 = arith.constant 0.176776692 : f32
    %64 = vector.broadcast %cst_28 : f32 to vector<10x8xf32>
    %65 = arith.mulf %63, %64 : vector<10x8xf32>
    %66 = vector.shape_cast %65 : vector<10x8xf32> to vector<1x10x8xf32>
    %cst_29 = arith.constant dense<0xFF800000> : vector<1xf32>
    %67 = vector.multi_reduction <maximumf>, %66, %cst_29 [1, 2] : vector<1x10x8xf32> to vector<1xf32>
    %68 = vector.shape_cast %67 : vector<1xf32> to vector<1x1x1xf32>
    %69 = vector.extract %68[0, 0, 0] : f32 from vector<1x1x1xf32>
    %70 = vector.broadcast %69 : f32 to vector<1x1xf32>
    %71 = vector.broadcast %70 : vector<1x1xf32> to vector<10x8xf32>
    %72 = arith.subf %65, %71 : vector<10x8xf32>
    %73 = math.exp %72 : vector<10x8xf32>
    %cst_30 = arith.constant dense<0.000000e+00> : vector<10x256xf32>
    %74 = tpu.matmul %73, %54, %cst_30 {dimension_numbers = #tpu.dot_dimension_numbers<[1], [0], [0], [1], [0, 0, 1, 1], [], []>} : vector<10x8xf32>, vector<8x256xf32>, vector<10x256xf32> -> vector<10x256xf32>
    %75 = arith.mulf %74, %60 : vector<10x256xf32>
    %76 = tpu.concatenate %75, %74 in 1 : vector<10x256xf32>, vector<10x256xf32> -> vector<10x512xf32>
    %77 = tpu.iota {dimensions = array<i32: 1>} : vector<2x10xi32>
    %78 = tpu.iota {dimensions = array<i32: 0>} : vector<2x10xi32>
    %c5_i32 = arith.constant 5 : i32
    %79 = vector.broadcast %c5_i32 : i32 to vector<2x10xi32>
    %80 = arith.muli %78, %79 : vector<2x10xi32>
    %81 = arith.cmpi sge, %77, %80 : vector<2x10xi32>
    %c1_i32_31 = arith.constant 1 : i32
    %82 = vector.broadcast %c1_i32_31 : i32 to vector<2x10xi32>
    %83 = arith.addi %78, %82 : vector<2x10xi32>
    %c5_i32_32 = arith.constant 5 : i32
    %84 = vector.broadcast %c5_i32_32 : i32 to vector<2x10xi32>
    %85 = arith.muli %83, %84 : vector<2x10xi32>
    %86 = arith.cmpi slt, %77, %85 : vector<2x10xi32>
    %87 = arith.andi %81, %86 : vector<2x10xi1>
    %88 = arith.extui %87 : vector<2x10xi1> to vector<2x10xi32>
    %89 = arith.sitofp %88 : vector<2x10xi32> to vector<2x10xf32>
    %cst_33 = arith.constant dense<0.000000e+00> : vector<2x512xf32>
    %90 = tpu.matmul %89, %76, %cst_33 {dimension_numbers = #tpu.dot_dimension_numbers<[1], [0], [0], [1], [0, 0, 1, 1], [], []>} : vector<2x10xf32>, vector<10x512xf32>, vector<2x512xf32> -> vector<2x512xf32>
    %91 = vector.extract_strided_slice %90 {offsets = [0, 256], sizes = [2, 256], strides = [1, 1]} : vector<2x512xf32> to vector<2x256xf32>
    %cst_34 = arith.constant 1.000000e-30 : f32
    %92 = vector.broadcast %cst_34 : f32 to vector<2x256xf32>
    %93 = arith.maximumf %91, %92 : vector<2x256xf32>
    %94 = vector.extract_strided_slice %90 {offsets = [0, 0], sizes = [2, 256], strides = [1, 1]} : vector<2x512xf32> to vector<2x256xf32>
    %95 = tpu.reciprocal %93 {approx = true} : vector<2x256xf32> -> vector<2x256xf32>
    %96 = arith.mulf %94, %95 : vector<2x256xf32>
    %97 = tpu.concatenate %50, %96 in 1 : vector<2x384xf32>, vector<2x256xf32> -> vector<2x640xf32>
    %98 = vector.extract_strided_slice %0 {offsets = [2, 0], sizes = [1, 640], strides = [1, 1]} : vector<8x1152xf32> to vector<1x640xf32>
    %99 = vector.extract_strided_slice %0 {offsets = [3, 0], sizes = [1, 640], strides = [1, 1]} : vector<8x1152xf32> to vector<1x640xf32>
    %100 = vector.extract_strided_slice %97 {offsets = [0, 0], sizes = [2, 128], strides = [1, 1]} : vector<2x640xf32> to vector<2x128xf32>
    %cst_35 = arith.constant dense<0.000000e+00> : vector<2xf32>
    %101 = vector.multi_reduction <add>, %100, %cst_35 [1] : vector<2x128xf32> to vector<2xf32>
    %102 = vector.shape_cast %101 : vector<2xf32> to vector<2x1xf32>
    %cst_36 = arith.constant 1.280000e+02 : f32
    %103 = vector.broadcast %cst_36 : f32 to vector<2x1xf32>
    %104 = arith.divf %102, %103 : vector<2x1xf32>
    %105 = vector.broadcast %104 : vector<2x1xf32> to vector<2x128xf32>
    %106 = arith.subf %100, %105 : vector<2x128xf32>
    %107 = arith.mulf %106, %106 : vector<2x128xf32>
    %cst_37 = arith.constant dense<0.000000e+00> : vector<2xf32>
    %108 = vector.multi_reduction <add>, %107, %cst_37 [1] : vector<2x128xf32> to vector<2xf32>
    %109 = vector.shape_cast %108 : vector<2xf32> to vector<2x1xf32>
    %cst_38 = arith.constant 1.280000e+02 : f32
    %110 = vector.broadcast %cst_38 : f32 to vector<2x1xf32>
    %111 = arith.divf %109, %110 : vector<2x1xf32>
    %112 = vector.broadcast %104 : vector<2x1xf32> to vector<2x128xf32>
    %113 = arith.subf %100, %112 : vector<2x128xf32>
    %cst_39 = arith.constant 9.99999974E-6 : f32
    %114 = vector.broadcast %cst_39 : f32 to vector<2x1xf32>
    %115 = arith.addf %111, %114 : vector<2x1xf32>
    %116 = math.rsqrt %115 : vector<2x1xf32>
    %117 = vector.broadcast %116 : vector<2x1xf32> to vector<2x128xf32>
    %118 = arith.mulf %113, %117 : vector<2x128xf32>
    %119 = vector.extract_strided_slice %97 {offsets = [0, 128], sizes = [2, 128], strides = [1, 1]} : vector<2x640xf32> to vector<2x128xf32>
    %cst_40 = arith.constant dense<0.000000e+00> : vector<2xf32>
    %120 = vector.multi_reduction <add>, %119, %cst_40 [1] : vector<2x128xf32> to vector<2xf32>
    %121 = vector.shape_cast %120 : vector<2xf32> to vector<2x1xf32>
    %cst_41 = arith.constant 1.280000e+02 : f32
    %122 = vector.broadcast %cst_41 : f32 to vector<2x1xf32>
    %123 = arith.divf %121, %122 : vector<2x1xf32>
    %124 = vector.broadcast %123 : vector<2x1xf32> to vector<2x128xf32>
    %125 = arith.subf %119, %124 : vector<2x128xf32>
    %126 = arith.mulf %125, %125 : vector<2x128xf32>
    %cst_42 = arith.constant dense<0.000000e+00> : vector<2xf32>
    %127 = vector.multi_reduction <add>, %126, %cst_42 [1] : vector<2x128xf32> to vector<2xf32>
    %128 = vector.shape_cast %127 : vector<2xf32> to vector<2x1xf32>
    %cst_43 = arith.constant 1.280000e+02 : f32
    %129 = vector.broadcast %cst_43 : f32 to vector<2x1xf32>
    %130 = arith.divf %128, %129 : vector<2x1xf32>
    %131 = vector.broadcast %123 : vector<2x1xf32> to vector<2x128xf32>
    %132 = arith.subf %119, %131 : vector<2x128xf32>
    %cst_44 = arith.constant 9.99999974E-6 : f32
    %133 = vector.broadcast %cst_44 : f32 to vector<2x1xf32>
    %134 = arith.addf %130, %133 : vector<2x1xf32>
    %135 = math.rsqrt %134 : vector<2x1xf32>
    %136 = vector.broadcast %135 : vector<2x1xf32> to vector<2x128xf32>
    %137 = arith.mulf %132, %136 : vector<2x128xf32>
    %138 = vector.extract_strided_slice %97 {offsets = [0, 256], sizes = [2, 128], strides = [1, 1]} : vector<2x640xf32> to vector<2x128xf32>
    %cst_45 = arith.constant dense<0.000000e+00> : vector<2xf32>
    %139 = vector.multi_reduction <add>, %138, %cst_45 [1] : vector<2x128xf32> to vector<2xf32>
    %140 = vector.shape_cast %139 : vector<2xf32> to vector<2x1xf32>
    %cst_46 = arith.constant 1.280000e+02 : f32
    %141 = vector.broadcast %cst_46 : f32 to vector<2x1xf32>
    %142 = arith.divf %140, %141 : vector<2x1xf32>
    %143 = vector.broadcast %142 : vector<2x1xf32> to vector<2x128xf32>
    %144 = arith.subf %138, %143 : vector<2x128xf32>
    %145 = arith.mulf %144, %144 : vector<2x128xf32>
    %cst_47 = arith.constant dense<0.000000e+00> : vector<2xf32>
    %146 = vector.multi_reduction <add>, %145, %cst_47 [1] : vector<2x128xf32> to vector<2xf32>
    %147 = vector.shape_cast %146 : vector<2xf32> to vector<2x1xf32>
    %cst_48 = arith.constant 1.280000e+02 : f32
    %148 = vector.broadcast %cst_48 : f32 to vector<2x1xf32>
    %149 = arith.divf %147, %148 : vector<2x1xf32>
    %150 = vector.broadcast %142 : vector<2x1xf32> to vector<2x128xf32>
    %151 = arith.subf %138, %150 : vector<2x128xf32>
    %cst_49 = arith.constant 9.99999974E-6 : f32
    %152 = vector.broadcast %cst_49 : f32 to vector<2x1xf32>
    %153 = arith.addf %149, %152 : vector<2x1xf32>
    %154 = math.rsqrt %153 : vector<2x1xf32>
    %155 = vector.broadcast %154 : vector<2x1xf32> to vector<2x128xf32>
    %156 = arith.mulf %151, %155 : vector<2x128xf32>
    %157 = vector.extract_strided_slice %97 {offsets = [0, 384], sizes = [2, 128], strides = [1, 1]} : vector<2x640xf32> to vector<2x128xf32>
    %cst_50 = arith.constant dense<0.000000e+00> : vector<2xf32>
    %158 = vector.multi_reduction <add>, %157, %cst_50 [1] : vector<2x128xf32> to vector<2xf32>
    %159 = vector.shape_cast %158 : vector<2xf32> to vector<2x1xf32>
    %cst_51 = arith.constant 1.280000e+02 : f32
    %160 = vector.broadcast %cst_51 : f32 to vector<2x1xf32>
    %161 = arith.divf %159, %160 : vector<2x1xf32>
    %162 = vector.broadcast %161 : vector<2x1xf32> to vector<2x128xf32>
    %163 = arith.subf %157, %162 : vector<2x128xf32>
    %164 = arith.mulf %163, %163 : vector<2x128xf32>
    %cst_52 = arith.constant dense<0.000000e+00> : vector<2xf32>
    %165 = vector.multi_reduction <add>, %164, %cst_52 [1] : vector<2x128xf32> to vector<2xf32>
    %166 = vector.shape_cast %165 : vector<2xf32> to vector<2x1xf32>
    %cst_53 = arith.constant 1.280000e+02 : f32
    %167 = vector.broadcast %cst_53 : f32 to vector<2x1xf32>
    %168 = arith.divf %166, %167 : vector<2x1xf32>
    %169 = vector.broadcast %161 : vector<2x1xf32> to vector<2x128xf32>
    %170 = arith.subf %157, %169 : vector<2x128xf32>
    %cst_54 = arith.constant 9.99999974E-6 : f32
    %171 = vector.broadcast %cst_54 : f32 to vector<2x1xf32>
    %172 = arith.addf %168, %171 : vector<2x1xf32>
    %173 = math.rsqrt %172 : vector<2x1xf32>
    %174 = vector.broadcast %173 : vector<2x1xf32> to vector<2x128xf32>
    %175 = arith.mulf %170, %174 : vector<2x128xf32>
    %176 = vector.extract_strided_slice %97 {offsets = [0, 512], sizes = [2, 128], strides = [1, 1]} : vector<2x640xf32> to vector<2x128xf32>
    %cst_55 = arith.constant dense<0.000000e+00> : vector<2xf32>
    %177 = vector.multi_reduction <add>, %176, %cst_55 [1] : vector<2x128xf32> to vector<2xf32>
    %178 = vector.shape_cast %177 : vector<2xf32> to vector<2x1xf32>
    %cst_56 = arith.constant 1.280000e+02 : f32
    %179 = vector.broadcast %cst_56 : f32 to vector<2x1xf32>
    %180 = arith.divf %178, %179 : vector<2x1xf32>
    %181 = vector.broadcast %180 : vector<2x1xf32> to vector<2x128xf32>
    %182 = arith.subf %176, %181 : vector<2x128xf32>
    %183 = arith.mulf %182, %182 : vector<2x128xf32>
    %cst_57 = arith.constant dense<0.000000e+00> : vector<2xf32>
    %184 = vector.multi_reduction <add>, %183, %cst_57 [1] : vector<2x128xf32> to vector<2xf32>
    %185 = vector.shape_cast %184 : vector<2xf32> to vector<2x1xf32>
    %cst_58 = arith.constant 1.280000e+02 : f32
    %186 = vector.broadcast %cst_58 : f32 to vector<2x1xf32>
    %187 = arith.divf %185, %186 : vector<2x1xf32>
    %188 = vector.broadcast %180 : vector<2x1xf32> to vector<2x128xf32>
    %189 = arith.subf %176, %188 : vector<2x128xf32>
    %cst_59 = arith.constant 9.99999974E-6 : f32
    %190 = vector.broadcast %cst_59 : f32 to vector<2x1xf32>
    %191 = arith.addf %187, %190 : vector<2x1xf32>
    %192 = math.rsqrt %191 : vector<2x1xf32>
    %193 = vector.broadcast %192 : vector<2x1xf32> to vector<2x128xf32>
    %194 = arith.mulf %189, %193 : vector<2x128xf32>
    %195 = tpu.concatenate %118, %137, %156, %175, %194 in 1 : vector<2x128xf32>, vector<2x128xf32>, vector<2x128xf32>, vector<2x128xf32>, vector<2x128xf32> -> vector<2x640xf32>
    %196 = vector.broadcast %98 : vector<1x640xf32> to vector<2x640xf32>
    %197 = arith.mulf %195, %196 : vector<2x640xf32>
    %198 = vector.broadcast %99 : vector<1x640xf32> to vector<2x640xf32>
    %199 = arith.addf %197, %198 : vector<2x640xf32>
    %cst_60 = arith.constant 0.000000e+00 : f32
    %200 = vector.broadcast %cst_60 : f32 to vector<2x640xf32>
    %201 = arith.maximumf %199, %200 : vector<2x640xf32>
    %c0_61 = arith.constant 0 : index
    %c0_62 = arith.constant 0 : index
    %202 = vector.load %arg10[%c0_61, %c0_62] : memref<668x64xf32, #tpu.memory_space<vmem>>, vector<668x64xf32>
    %203 = vector.extract_strided_slice %202 {offsets = [0, 0], sizes = [640, 64], strides = [1, 1]} : vector<668x64xf32> to vector<640x64xf32>
    %cst_63 = arith.constant dense<0.000000e+00> : vector<2x64xf32>
    %204 = tpu.matmul %201, %203, %cst_63 {dimension_numbers = #tpu.dot_dimension_numbers<[1], [0], [0], [1], [0, 0, 1, 1], [], []>} : vector<2x640xf32>, vector<640x64xf32>, vector<2x64xf32> -> vector<2x64xf32>
    %205 = vector.extract_strided_slice %202 {offsets = [640, 0], sizes = [28, 64], strides = [1, 1]} : vector<668x64xf32> to vector<28x64xf32>
    %cst_64 = arith.constant dense<0.000000e+00> : vector<2x64xf32>
    %206 = tpu.matmul %3, %205, %cst_64 {dimension_numbers = #tpu.dot_dimension_numbers<[1], [0], [0], [1], [0, 0, 1, 1], [], []>} : vector<2x28xf32>, vector<28x64xf32>, vector<2x64xf32> -> vector<2x64xf32>
    %207 = arith.addf %204, %206 : vector<2x64xf32>
    %208 = vector.extract_strided_slice %0 {offsets = [4, 0], sizes = [1, 64], strides = [1, 1]} : vector<8x1152xf32> to vector<1x64xf32>
    %209 = vector.broadcast %208 : vector<1x64xf32> to vector<2x64xf32>
    %210 = arith.addf %207, %209 : vector<2x64xf32>
    %cst_65 = arith.constant 0.000000e+00 : f32
    %211 = vector.broadcast %cst_65 : f32 to vector<2x64xf32>
    %212 = arith.maximumf %210, %211 : vector<2x64xf32>
    %213 = vector.broadcast %4 : vector<2x1xf32> to vector<2x64xf32>
    %214 = arith.mulf %2, %213 : vector<2x64xf32>
    %215 = tpu.concatenate %212, %214 in 1 : vector<2x64xf32>, vector<2x64xf32> -> vector<2x128xf32>
    %c0_66 = arith.constant 0 : index
    %c0_67 = arith.constant 0 : index
    %216 = vector.load %arg11[%c0_66, %c0_67] : memref<128x256xf32, #tpu.memory_space<vmem>>, vector<128x256xf32>
    %cst_68 = arith.constant dense<0.000000e+00> : vector<2x256xf32>
    %217 = tpu.matmul %215, %216, %cst_68 {dimension_numbers = #tpu.dot_dimension_numbers<[1], [0], [0], [1], [0, 0, 1, 1], [], []>} : vector<2x128xf32>, vector<128x256xf32>, vector<2x256xf32> -> vector<2x256xf32>
    %218 = vector.extract_strided_slice %0 {offsets = [4, 64], sizes = [1, 256], strides = [1, 1]} : vector<8x1152xf32> to vector<1x256xf32>
    %219 = vector.broadcast %218 : vector<1x256xf32> to vector<2x256xf32>
    %220 = arith.addf %217, %219 : vector<2x256xf32>
    %221 = vector.extract_strided_slice %220 {offsets = [0, 0], sizes = [2, 128], strides = [1, 1]} : vector<2x256xf32> to vector<2x128xf32>
    %222 = arith.negf %221 : vector<2x128xf32>
    %223 = math.exp %222 : vector<2x128xf32>
    %cst_69 = arith.constant 1.000000e+00 : f32
    %224 = vector.broadcast %cst_69 : f32 to vector<2x128xf32>
    %225 = arith.addf %224, %223 : vector<2x128xf32>
    %226 = arith.divf %224, %225 : vector<2x128xf32>
    %227 = vector.extract_strided_slice %226 {offsets = [0, 0], sizes = [2, 64], strides = [1, 1]} : vector<2x128xf32> to vector<2x64xf32>
    %228 = vector.extract_strided_slice %226 {offsets = [0, 64], sizes = [2, 64], strides = [1, 1]} : vector<2x128xf32> to vector<2x64xf32>
    %229 = vector.extract_strided_slice %220 {offsets = [0, 128], sizes = [2, 64], strides = [1, 1]} : vector<2x256xf32> to vector<2x64xf32>
    %230 = vector.extract_strided_slice %220 {offsets = [0, 192], sizes = [2, 64], strides = [1, 1]} : vector<2x256xf32> to vector<2x64xf32>
    %231 = arith.mulf %227, %230 : vector<2x64xf32>
    %232 = arith.addf %229, %231 : vector<2x64xf32>
    %233 = math.tanh %232 : vector<2x64xf32>
    %cst_70 = arith.constant 1.000000e+00 : f32
    %234 = vector.broadcast %cst_70 : f32 to vector<2x64xf32>
    %235 = arith.subf %234, %228 : vector<2x64xf32>
    %236 = arith.mulf %235, %233 : vector<2x64xf32>
    %237 = arith.mulf %228, %214 : vector<2x64xf32>
    %238 = arith.addf %236, %237 : vector<2x64xf32>
    %c0_71 = arith.constant 0 : index
    %c0_72 = arith.constant 0 : index
    %239 = vector.load %arg12[%c0_71, %c0_72] : memref<320x128xf32, #tpu.memory_space<vmem>>, vector<320x128xf32>
    %240 = vector.extract_strided_slice %239 {offsets = [0, 0], sizes = [64, 128], strides = [1, 1]} : vector<320x128xf32> to vector<64x128xf32>
    %cst_73 = arith.constant dense<0.000000e+00> : vector<2x128xf32>
    %241 = tpu.matmul %238, %240, %cst_73 {dimension_numbers = #tpu.dot_dimension_numbers<[1], [0], [0], [1], [0, 0, 1, 1], [], []>} : vector<2x64xf32>, vector<64x128xf32>, vector<2x128xf32> -> vector<2x128xf32>
    %242 = vector.extract_strided_slice %0 {offsets = [4, 320], sizes = [1, 128], strides = [1, 1]} : vector<8x1152xf32> to vector<1x128xf32>
    %243 = vector.broadcast %242 : vector<1x128xf32> to vector<2x128xf32>
    %244 = arith.addf %241, %243 : vector<2x128xf32>
    %cst_74 = arith.constant 0.000000e+00 : f32
    %245 = vector.broadcast %cst_74 : f32 to vector<2x128xf32>
    %246 = arith.maximumf %244, %245 : vector<2x128xf32>
    %247 = vector.extract_strided_slice %239 {offsets = [64, 0], sizes = [128, 128], strides = [1, 1]} : vector<320x128xf32> to vector<128x128xf32>
    %cst_75 = arith.constant dense<0.000000e+00> : vector<2x128xf32>
    %248 = tpu.matmul %246, %247, %cst_75 {dimension_numbers = #tpu.dot_dimension_numbers<[1], [0], [0], [1], [0, 0, 1, 1], [], []>} : vector<2x128xf32>, vector<128x128xf32>, vector<2x128xf32> -> vector<2x128xf32>
    %249 = vector.extract_strided_slice %0 {offsets = [4, 448], sizes = [1, 128], strides = [1, 1]} : vector<8x1152xf32> to vector<1x128xf32>
    %250 = vector.broadcast %249 : vector<1x128xf32> to vector<2x128xf32>
    %251 = arith.addf %248, %250 : vector<2x128xf32>
    %cst_76 = arith.constant 0.000000e+00 : f32
    %252 = vector.broadcast %cst_76 : f32 to vector<2x128xf32>
    %253 = arith.maximumf %251, %252 : vector<2x128xf32>
    %254 = vector.extract_strided_slice %239 {offsets = [192, 0], sizes = [128, 128], strides = [1, 1]} : vector<320x128xf32> to vector<128x128xf32>
    %cst_77 = arith.constant dense<0.000000e+00> : vector<2x128xf32>
    %255 = tpu.matmul %253, %254, %cst_77 {dimension_numbers = #tpu.dot_dimension_numbers<[1], [0], [0], [1], [0, 0, 1, 1], [], []>} : vector<2x128xf32>, vector<128x128xf32>, vector<2x128xf32> -> vector<2x128xf32>
    %256 = vector.extract_strided_slice %0 {offsets = [4, 576], sizes = [1, 128], strides = [1, 1]} : vector<8x1152xf32> to vector<1x128xf32>
    %257 = vector.broadcast %256 : vector<1x128xf32> to vector<2x128xf32>
    %258 = arith.addf %255, %257 : vector<2x128xf32>
    %259 = vector.extract_strided_slice %258 {offsets = [0, 0], sizes = [2, 1], strides = [1, 1]} : vector<2x128xf32> to vector<2x1xf32>
    %260 = vector.extract_strided_slice %258 {offsets = [0, 1], sizes = [2, 2], strides = [1, 1]} : vector<2x128xf32> to vector<2x2xf32>
    %261 = vector.extract_strided_slice %258 {offsets = [0, 3], sizes = [2, 1], strides = [1, 1]} : vector<2x128xf32> to vector<2x1xf32>
    %262 = vector.extract_strided_slice %258 {offsets = [0, 4], sizes = [2, 1], strides = [1, 1]} : vector<2x128xf32> to vector<2x1xf32>
    %263 = vector.extract_strided_slice %0 {offsets = [4, 704], sizes = [1, 1], strides = [1, 1]} : vector<8x1152xf32> to vector<1x1xf32>
    %264 = arith.cmpf ogt, %262, %261 : vector<2x1xf32>
    %265 = arith.extui %264 : vector<2x1xi1> to vector<2x1xi32>
    %266 = arith.sitofp %265 : vector<2x1xi32> to vector<2x1xf32>
    %267 = arith.maximumf %261, %262 : vector<2x1xf32>
    %268 = arith.subf %261, %267 : vector<2x1xf32>
    %269 = math.exp %268 : vector<2x1xf32>
    %270 = arith.subf %262, %267 : vector<2x1xf32>
    %271 = math.exp %270 : vector<2x1xf32>
    %272 = arith.addf %269, %271 : vector<2x1xf32>
    %273 = math.log %272 : vector<2x1xf32>
    %274 = arith.addf %267, %273 : vector<2x1xf32>
    %275 = arith.subf %267, %274 : vector<2x1xf32>
    %276 = vector.broadcast %263 : vector<1x1xf32> to vector<2x1xf32>
    %277 = arith.addf %275, %276 : vector<2x1xf32>
    %cst_78 = arith.constant 0.000000e+00 : f32
    %278 = vector.broadcast %cst_78 : f32 to vector<2x59xf32>
    %279 = tpu.concatenate %238, %259, %260, %266, %277, %278 in 1 : vector<2x64xf32>, vector<2x1xf32>, vector<2x2xf32>, vector<2x1xf32>, vector<2x1xf32>, vector<2x59xf32> -> vector<2x128xf32>
    %c0_79 = arith.constant 0 : index
    %c0_80 = arith.constant 0 : index
    %280 = vector.load %arg14[%c0_79, %c0_80] : memref<2x128xf32, #tpu.memory_space<vmem>>, vector<2x128xf32>
    tpu.vector_store %arg14[%c0_79, %c0_80], %279 {strides = array<i32>} : memref<2x128xf32, #tpu.memory_space<vmem>>, vector<2x128xf32>,
    return
  }
  func.func @transform_0(%arg0: i32) -> (i32, i32) {
    %c0_i32 = arith.constant 0 : i32
    %c0_i32_0 = arith.constant 0 : i32
    return %arg0, %c0_i32 : i32, i32
  }
  func.func @transform_1(%arg0: i32) -> (i32, i32) {
    %c0_i32 = arith.constant 0 : i32
    %c0_i32_0 = arith.constant 0 : i32
    return %arg0, %c0_i32 : i32, i32
  }
  func.func @transform_2(%arg0: i32) -> (i32, i32) {
    %c0_i32 = arith.constant 0 : i32
    %c0_i32_0 = arith.constant 0 : i32
    return %arg0, %c0_i32 : i32, i32
  }
  func.func @transform_3(%arg0: i32) -> (i32, i32) {
    %c0_i32 = arith.constant 0 : i32
    %c0_i32_0 = arith.constant 0 : i32
    %c0_i32_1 = arith.constant 0 : i32
    return %c0_i32, %c0_i32_0 : i32, i32
  }
  func.func @transform_4(%arg0: i32) -> (i32, i32) {
    %c0_i32 = arith.constant 0 : i32
    %c0_i32_0 = arith.constant 0 : i32
    %c0_i32_1 = arith.constant 0 : i32
    return %c0_i32, %c0_i32_0 : i32, i32
  }
  func.func @transform_5(%arg0: i32) -> (i32, i32) {
    %c0_i32 = arith.constant 0 : i32
    %c0_i32_0 = arith.constant 0 : i32
    %c0_i32_1 = arith.constant 0 : i32
    return %c0_i32, %c0_i32_0 : i32, i32
  }
  func.func @transform_6(%arg0: i32) -> (i32, i32) {
    %c0_i32 = arith.constant 0 : i32
    %c0_i32_0 = arith.constant 0 : i32
    %c0_i32_1 = arith.constant 0 : i32
    return %c0_i32, %c0_i32_0 : i32, i32
  }
  func.func @transform_7(%arg0: i32) -> (i32, i32) {
    %c0_i32 = arith.constant 0 : i32
    %c0_i32_0 = arith.constant 0 : i32
    %c0_i32_1 = arith.constant 0 : i32
    return %c0_i32, %c0_i32_0 : i32, i32
  }
  func.func @transform_8(%arg0: i32) -> (i32, i32) {
    %c0_i32 = arith.constant 0 : i32
    %c0_i32_0 = arith.constant 0 : i32
    %c0_i32_1 = arith.constant 0 : i32
    return %c0_i32, %c0_i32_0 : i32, i32
  }
  func.func @transform_9(%arg0: i32) -> (i32, i32) {
    %c0_i32 = arith.constant 0 : i32
    %c0_i32_0 = arith.constant 0 : i32
    %c0_i32_1 = arith.constant 0 : i32
    return %c0_i32, %c0_i32_0 : i32, i32
  }
  func.func @transform_10(%arg0: i32) -> (i32, i32) {
    %c0_i32 = arith.constant 0 : i32
    %c0_i32_0 = arith.constant 0 : i32
    %c0_i32_1 = arith.constant 0 : i32
    return %c0_i32, %c0_i32_0 : i32, i32
  }
  func.func @transform_11(%arg0: i32) -> (i32, i32) {
    %c0_i32 = arith.constant 0 : i32
    %c0_i32_0 = arith.constant 0 : i32
    %c0_i32_1 = arith.constant 0 : i32
    return %c0_i32, %c0_i32_0 : i32, i32
  }
  func.func @transform_12(%arg0: i32) -> (i32, i32) {
    %c0_i32 = arith.constant 0 : i32
    %c0_i32_0 = arith.constant 0 : i32
    %c0_i32_1 = arith.constant 0 : i32
    return %c0_i32, %c0_i32_0 : i32, i32
  }
  func.func @transform_13(%arg0: i32) -> (i32, i32) {
    %c0_i32 = arith.constant 0 : i32
    %c0_i32_0 = arith.constant 0 : i32
    return %arg0, %c0_i32 : i32, i32
  }
}

</mosaic_0001>

<bundles_post_ra>
// kernel: policy_act.1
= control target key start
LH: loop header
LB: loop body
LE: loop exit
PB: predicated region body
PF: predicated region fallthrough
CT: control target
= control target key end

     0   :  { %vm220_vm0 = vcmask 1040384   ;;  %vm210_vm1 = vcmask 596992   ;;  %vm572_vm2 = vcmask 97280   ;;  %vm575_vm3 = vcmask 93184   ;;  %s2161_s24 = smov 1   ;;  %s3768_s3 = inlined_call_operand.vmem [shape: f32[73,1152], index: 3, kind: input, shape index: {}]   ;;  %s3769_s1 = inlined_call_operand.vmem [shape: f32[20,73], index: 1, kind: input, shape index: {}]   ;;  %s3770_s5 = inlined_call_operand.vmem [shape: f32[384,12], index: 5, kind: input, shape index: {}]   ;;  %s3771_s12 = inlined_call_operand.vmem [shape: f32[8,1152], index: 12, kind: input, shape index: {}]   ;;  %s3772_s6 = inlined_call_operand.vmem [shape: f32[12,384], index: 6, kind: input, shape index: {}]   ;;  %s3773_s4 = inlined_call_operand.vmem [shape: f32[40,768], index: 4, kind: input, shape index: {}]   ;;  %s3774_s2 = inlined_call_operand.vmem [shape: f32[10,40], index: 2, kind: input, shape index: {}]   ;;  %s3775_s7 = inlined_call_operand.vmem [shape: f32[256,8], index: 7, kind: input, shape index: {}]   ;;  %s3776_s8 = inlined_call_operand.vmem [shape: f32[8,256], index: 8, kind: input, shape index: {}]   ;;  %s3777_s9 = inlined_call_operand.vmem [shape: f32[668,64], index: 9, kind: input, shape index: {}]   ;;  %s3778_s0 = inlined_call_operand.vmem [shape: f32[2,93], index: 0, kind: input, shape index: {}]   ;;  %s3779_s10 = inlined_call_operand.vmem [shape: f32[128,256], index: 10, kind: input, shape index: {}]   ;;  %s3780_s11 = inlined_call_operand.vmem [shape: f32[320,128], index: 11, kind: input, shape index: {}]   ;;  %s3781_s13 = inlined_call_operand.vmem [shape: f32[2,128], index: 13, kind: output, shape index: {}]  }
   0x1   :  { %v138_v0 = vld [vmem:[%s3768_s3 + $0x288] sm:$0x1]  ;;  %v140_v1 = vld [vmem:[%s3768_s3 + $0x298] sm:$0x1]  ;;  %v141_v2 = vld [vmem:[%s3768_s3 + $0x2a0] sm:$0x1] }
   0x2   :  { %1998 = vmatpush.msk.msra.mxu0 %vm220_vm0, %v138_v0  ;;  %2006 = vmatpush.msk.msra.mxu2 %vm220_vm0, %v140_v1  ;;  %v129_v3 = vld [vmem:[%s3768_s3 + $0x240] sm:$0xff]  ;;  %v131_v4 = vld [vmem:[%s3768_s3 + $0x250] sm:$0xff]  ;;  %v132_v5 = vld [vmem:[%s3768_s3 + $0x258] sm:$0xff]  ;;  %vm607_vm4 = vcmask 1043456   ;;  %vm939_vm5 = vcmask 326656   ;;  %vm716_vm9 = vcmask 162816  }
   0x3   :  { %2010 = vmatpush.msk.msra.mxu3 %vm220_vm0, %v141_v2  ;;  %v120_v6 = vld [vmem:[%s3768_s3 + $0x1f8] sm:$0xff]  ;;  %v122_v7 = vld [vmem:[%s3768_s3 + $0x208] sm:$0xff]  ;;  %v123_v8 = vld [vmem:[%s3768_s3 + $0x210] sm:$0xff]  ;;  %vm1224_vm10 = vcmask 1041408   ;;  %vm1136_vm12 = vcmask 64512   ;;  %vm1138_vm13 = vcmask 58368  }
   0x4   :  { %255 = vmatpush.msra.mxu0 %v129_v3  ;;  %307 = vmatpush.msra.mxu2 %v131_v4  ;;  %v111_v9 = vld [vmem:[%s3768_s3 + $0x1b0] sm:$0xff]  ;;  %v113_v10 = vld [vmem:[%s3768_s3 + $0x1c0] sm:$0xff]  ;;  %v114_v11 = vld [vmem:[%s3768_s3 + $0x1c8] sm:$0xff] }
   0x5   :  { %333 = vmatpush.msra.mxu3 %v132_v5  ;;  %v102_v12 = vld [vmem:[%s3768_s3 + $0x168] sm:$0xff]  ;;  %v104_v13 = vld [vmem:[%s3768_s3 + $0x178] sm:$0xff]  ;;  %v105_v14 = vld [vmem:[%s3768_s3 + $0x180] sm:$0xff] }
   0x6   :  { %256 = vmatpush.msra.mxu0 %v120_v6  ;;  %308 = vmatpush.msra.mxu2 %v122_v7  ;;  %v93_v15 = vld [vmem:[%s3768_s3 + $0x120] sm:$0xff]  ;;  %v95_v16 = vld [vmem:[%s3768_s3 + $0x130] sm:$0xff]  ;;  %v96_v17 = vld [vmem:[%s3768_s3 + $0x138] sm:$0xff] }
   0x7   :  { %334 = vmatpush.msra.mxu3 %v123_v8  ;;  %v84_v18 = vld [vmem:[%s3768_s3 + $0xd8] sm:$0xff]  ;;  %v86_v19 = vld [vmem:[%s3768_s3 + $0xe8] sm:$0xff]  ;;  %v87_v20 = vld [vmem:[%s3768_s3 + $0xf0] sm:$0xff] }
   0x8   :  { %257 = vmatpush.msra.mxu0 %v111_v9  ;;  %309 = vmatpush.msra.mxu2 %v113_v10  ;;  %v75_v21 = vld [vmem:[%s3768_s3 + $0x90] sm:$0xff]  ;;  %v77_v22 = vld [vmem:[%s3768_s3 + $0xa0] sm:$0xff]  ;;  %v78_v23 = vld [vmem:[%s3768_s3 + $0xa8] sm:$0xff] }
   0x9   :  { %335 = vmatpush.msra.mxu3 %v114_v11  ;;  %v139_v24 = vld [vmem:[%s3768_s3 + $0x290] sm:$0x1]  ;;  %v66_v25 = vld [vmem:[%s3768_s3 + $0x48] sm:$0xff]  ;;  %v68_v26 = vld [vmem:[%s3768_s3 + $0x58] sm:$0xff] }
   0xa   :  { %258 = vmatpush.msra.mxu0 %v102_v12  ;;  %310 = vmatpush.msra.mxu2 %v104_v13  ;;  %v69_v27 = vld [vmem:[%s3768_s3 + $0x60] sm:$0xff]  ;;  %v130_v28 = vld [vmem:[%s3768_s3 + $0x248] sm:$0xff]  ;;  %v59_v30 = vld [vmem:[%s3768_s3 + $0x10] sm:$0xff] }
   0xb   :  { %336 = vmatpush.msra.mxu3 %v105_v14  ;;  %2002 = vmatpush.msk.msra.mxu1 %vm220_vm0, %v139_v24  ;;  %v57_v29 = vld [vmem:[%s3768_s3] sm:$0xff]  ;;  %v60_v32 = vld [vmem:[%s3768_s3 + $0x18] sm:$0xff]  ;;  %v142_v34 = vld [vmem:[%s3768_s3 + $0x2a8] sm:$0x1] }
   0xc   :  { %259 = vmatpush.msra.mxu0 %v93_v15  ;;  %311 = vmatpush.msra.mxu2 %v95_v16  ;;  %v121_v31 = vld [vmem:[%s3768_s3 + $0x200] sm:$0xff]  ;;  %v144_v35 = vld [vmem:[%s3768_s3 + $0x2b8] sm:$0x1]  ;;  %v135_v39 = vld [vmem:[%s3768_s3 + $0x270] sm:$0xff] }
   0xd   :  { %337 = vmatpush.msra.mxu3 %v96_v17  ;;  %281 = vmatpush.msra.mxu1 %v130_v28  ;;  %v2341_v33 = vld [vmem:[%s3769_s1] sm:$0xff]  ;;  %v112_v37 = vld [vmem:[%s3768_s3 + $0x1b8] sm:$0xff]  ;;  %v103_v41 = vld [vmem:[%s3768_s3 + $0x170] sm:$0xff] }
   0xe   :  { %260 = vmatpush.msra.mxu0 %v84_v18  ;;  %312 = vmatpush.msra.mxu2 %v86_v19  ;;  %v145_v36 = vld [vmem:[%s3768_s3 + $0x2c0] sm:$0x1]  ;;  %v136_v40 = vld [vmem:[%s3768_s3 + $0x278] sm:$0xff]  ;;  %v126_v43 = vld [vmem:[%s3768_s3 + $0x228] sm:$0xff] }
   0xf   :  { %338 = vmatpush.msra.mxu3 %v87_v20  ;;  %282 = vmatpush.msra.mxu1 %v121_v31  ;;  %v133_v38 = vld [vmem:[%s3768_s3 + $0x260] sm:$0xff]  ;;  %v124_v42 = vld [vmem:[%s3768_s3 + $0x218] sm:$0xff]  ;;  %v127_v44 = vld [vmem:[%s3768_s3 + $0x230] sm:$0xff] }
  0x10   :  { %261 = vmatpush.msra.mxu0 %v75_v21  ;;  %313 = vmatpush.msra.mxu2 %v77_v22  ;;  %v94_v45 = vld [vmem:[%s3768_s3 + $0x128] sm:$0xff]  ;;  %v117_v47 = vld [vmem:[%s3768_s3 + $0x1e0] sm:$0xff]  ;;  %v115_v48 = vld [vmem:[%s3768_s3 + $0x1d0] sm:$0xff] }
  0x11   :  { %339 = vmatpush.msra.mxu3 %v78_v23  ;;  %283 = vmatpush.msra.mxu1 %v112_v37  ;;  %v2391_v46 = vld [vmem:[%s3769_s1 + $0x8] sm:$0xff]  ;;  %v108_v50 = vld [vmem:[%s3768_s3 + $0x198] sm:$0xff]  ;;  %v85_v51 = vld [vmem:[%s3768_s3 + $0xe0] sm:$0xff] }
  0x12   :  { %262 = vmatpush.msra.mxu0 %v66_v25  ;;  %314 = vmatpush.msra.mxu2 %v68_v26  ;;  %v118_v49 = vld [vmem:[%s3768_s3 + $0x1e8] sm:$0xff]  ;;  %v109_v53 = vld [vmem:[%s3768_s3 + $0x1a0] sm:$0xff]  ;;  %v99_v54 = vld [vmem:[%s3768_s3 + $0x150] sm:$0xff] }
  0x13   :  { %340 = vmatpush.msra.mxu3 %v69_v27  ;;  %284 = vmatpush.msra.mxu1 %v103_v41  ;;  %v106_v52 = vld [vmem:[%s3768_s3 + $0x188] sm:$0xff]  ;;  %v76_v55 = vld [vmem:[%s3768_s3 + $0x98] sm:$0xff]  ;;  %v97_v56 = vld [vmem:[%s3768_s3 + $0x140] sm:$0xff] }
  0x14   :  { %263 = vmatpush.msra.mxu0 %v57_v29  ;;  %315 = vmatpush.msra.mxu2 %v59_v30  ;;  %v100_v57 = vld [vmem:[%s3768_s3 + $0x158] sm:$0xff]  ;;  %v90_v58 = vld [vmem:[%s3768_s3 + $0x108] sm:$0xff]  ;;  %v67_v59 = vld [vmem:[%s3768_s3 + $0x50] sm:$0xff] }
  0x15   :  { %341 = vmatpush.msra.mxu3 %v60_v32  ;;  %1999 = vmatmul.msk.f32.vlgmr.msra.gmra.mxu0 %vm210_vm1, %v2341_v33  ;;  %v2441_v60 = vld [vmem:[%s3769_s1 + $0x10] sm:$0xf]  ;;  %v88_v62 = vld [vmem:[%s3768_s3 + $0xf8] sm:$0xff]  ;;  %v81_v63 = vld [vmem:[%s3768_s3 + $0xc0] sm:$0xff] }
  0x16   :  { %2007 = vmatmul.msk.f32.vlgmr.msra.gmra.mxu2 %vm210_vm1, %v2341_v33  ;;  %2011 = vmatmul.msk.f32.vlgmr.msra.gmra.mxu3 %vm210_vm1, %v2341_v33  ;;  %v91_v61 = vld [vmem:[%s3768_s3 + $0x110] sm:$0xff]  ;;  %v82_v0 = vld [vmem:[%s3768_s3 + $0xc8] sm:$0xff]  ;;  %v72_v3 = vld [vmem:[%s3768_s3 + $0x78] sm:$0xff] }
  0x17   :  { %2014 = vmatpush.msk.msrb.mxu0 %vm220_vm0, %v142_v34  ;;  %2022 = vmatpush.msk.msrb.mxu2 %vm220_vm0, %v144_v35  ;;  %v58_v1 = vld [vmem:[%s3768_s3 + $0x8] sm:$0xff]  ;;  %v79_v2 = vld [vmem:[%s3768_s3 + $0xb0] sm:$0xff]  ;;  %v73_v4 = vld [vmem:[%s3768_s3 + $0x80] sm:$0xff] }
  0x18   :  { %2026 = vmatpush.msk.msrb.mxu3 %vm220_vm0, %v145_v36  ;;  %285 = vmatpush.msra.mxu1 %v94_v45  ;;  %v70_v5 = vld [vmem:[%s3768_s3 + $0x68] sm:$0xff]  ;;  %v63_v6 = vld [vmem:[%s3768_s3 + $0x30] sm:$0xff]  ;;  %v64_v7 = vld [vmem:[%s3768_s3 + $0x38] sm:$0xff] }
  0x19   :  { %359 = vmatpush.msrb.mxu0 %v133_v38  ;;  %411 = vmatpush.msrb.mxu2 %v135_v39  ;;  %v61_v8 = vld [vmem:[%s3768_s3 + $0x20] sm:$0xff]  ;;  %v146_v9 = vld [vmem:[%s3768_s3 + $0x2c8] sm:$0x1]  ;;  %v128_v11 = vld [vmem:[%s3768_s3 + $0x238] sm:$0xff] }
  0x1a   :  { %437 = vmatpush.msrb.mxu3 %v136_v40  ;;  %286 = vmatpush.msra.mxu1 %v85_v51  ;;  %v137_v10 = vld [vmem:[%s3768_s3 + $0x280] sm:$0xff]  ;;  %v119_v12 = vld [vmem:[%s3768_s3 + $0x1f0] sm:$0xff]  ;;  %v110_v13 = vld [vmem:[%s3768_s3 + $0x1a8] sm:$0xff] }
  0x1b   :  { %360 = vmatpush.msrb.mxu0 %v124_v42  ;;  %412 = vmatpush.msrb.mxu2 %v126_v43  ;;  %v101_v14 = vld [vmem:[%s3768_s3 + $0x160] sm:$0xff]  ;;  %v143_v15 = vld [vmem:[%s3768_s3 + $0x2b0] sm:$0x1]  ;;  %v92_v16 = vld [vmem:[%s3768_s3 + $0x118] sm:$0xff] }
  0x1c   :  { %438 = vmatpush.msrb.mxu3 %v127_v44  ;;  %287 = vmatpush.msra.mxu1 %v76_v55  ;;  %v134_v17 = vld [vmem:[%s3768_s3 + $0x268] sm:$0xff]  ;;  %v83_v18 = vld [vmem:[%s3768_s3 + $0xd0] sm:$0xff]  ;;  %v125_v19 = vld [vmem:[%s3768_s3 + $0x220] sm:$0xff] }
  0x1d   :  { %2000 = vmatmul.msk.f32.gmra.mxu0 %vm210_vm1, %v2391_v46  ;;  %413 = vmatpush.msrb.mxu2 %v117_v47  ;;  %v74_v20 = vld [vmem:[%s3768_s3 + $0x88] sm:$0xff]  ;;  %v116_v21 = vld [vmem:[%s3768_s3 + $0x1d8] sm:$0xff]  ;;  %v65_v22 = vld [vmem:[%s3768_s3 + $0x40] sm:$0xff] }
  0x1e   :  { %2008 = vmatmul.msk.f32.gmra.mxu2 %vm210_vm1, %v2391_v46  ;;  %2012 = vmatmul.msk.f32.gmra.mxu3 %vm210_vm1, %v2391_v46  ;;  %v107_v23 = vld [vmem:[%s3768_s3 + $0x190] sm:$0xff]  ;;  %v98_v24 = vld [vmem:[%s3768_s3 + $0x148] sm:$0xff]  ;;  %v89_v25 = vld [vmem:[%s3768_s3 + $0x100] sm:$0xff] }
  0x1f   :  { %361 = vmatpush.msrb.mxu0 %v115_v48  ;;  %439 = vmatpush.msrb.mxu3 %v118_v49  ;;  %v80_v26 = vld [vmem:[%s3768_s3 + $0xb8] sm:$0xff]  ;;  %v71_v27 = vld [vmem:[%s3768_s3 + $0x70] sm:$0xff]  ;;  %v62_v28 = vld [vmem:[%s3768_s3 + $0x28] sm:$0xff] }
  0x20   :  { %414 = vmatpush.msrb.mxu2 %v108_v50  ;;  %288 = vmatpush.msra.mxu1 %v67_v59  ;;  %v162_v29 = vld [vmem:[%s3770_s5 + $0x78] sm:$0xff]  ;;  %v161_v31 = vld [vmem:[%s3770_s5 + $0x70] sm:$0xff]  ;;  %v160_v34 = vld [vmem:[%s3770_s5 + $0x68] sm:$0xff] }
  0x21   :  { %362 = vmatpush.msrb.mxu0 %v106_v52  ;;  %440 = vmatpush.msrb.mxu3 %v109_v53  ;;  %v178_v30 = vld [vmem:[%s3770_s5 + $0xf8] sm:$0xff]  ;;  %v177_v32 = vld [vmem:[%s3770_s5 + $0xf0] sm:$0xff]  ;;  %v176_v35 = vld [vmem:[%s3770_s5 + $0xe8] sm:$0xff] }
  0x22   :  { %415 = vmatpush.msrb.mxu2 %v99_v54  ;;  %289 = vmatpush.msra.mxu1 %v58_v1  ;;  %v175_v36 = vld [vmem:[%s3770_s5 + $0xe0] sm:$0xff]  ;;  %v158_v37 = vld [vmem:[%s3770_s5 + $0x58] sm:$0xff]  ;;  %v157_v39 = vld [vmem:[%s3770_s5 + $0x50] sm:$0xff] }
  0x23   :  { %363 = vmatpush.msrb.mxu0 %v97_v56  ;;  %441 = vmatpush.msrb.mxu3 %v100_v57  ;;  %v174_v38 = vld [vmem:[%s3770_s5 + $0xd8] sm:$0xff]  ;;  %v173_v40 = vld [vmem:[%s3770_s5 + $0xd0] sm:$0xff]  ;;  %v156_v41 = vld [vmem:[%s3770_s5 + $0x48] sm:$0xff] }
  0x24   :  { %416 = vmatpush.msrb.mxu2 %v90_v58  ;;  %2003 = vmatmul.msk.f32.vlgmr.msra.gmra.mxu1 %vm210_vm1, %v2341_v33  ;;  %v172_v42 = vld [vmem:[%s3770_s5 + $0xc8] sm:$0xff]  ;;  %v155_v43 = vld [vmem:[%s3770_s5 + $0x40] sm:$0xff]  ;;  %v154_v45 = vld [vmem:[%s3770_s5 + $0x38] sm:$0xff] }
  0x25   :  { %2001 = vmatmul.msk.f32.gmra.mxu0 %vm210_vm1, %v2441_v60  ;;  %442 = vmatpush.msrb.mxu3 %v91_v61  ;;  %v171_v44 = vld [vmem:[%s3770_s5 + $0xc0] sm:$0xff]  ;;  %v153_v47 = vld [vmem:[%s3770_s5 + $0x30] sm:$0xff]  ;;  %v194_v49 = vld [vmem:[%s3770_s5 + $0x178] sm:$0xff] }
  0x26   :  { %2009 = vmatmul.msk.f32.gmra.mxu2 %vm210_vm1, %v2441_v60  ;;  %2013 = vmatmul.msk.f32.gmra.mxu3 %vm210_vm1, %v2441_v60  ;;  %v169_v48 = vld [vmem:[%s3770_s5 + $0xb0] sm:$0xff]  ;;  %v152_v50 = vld [vmem:[%s3770_s5 + $0x28] sm:$0xff]  ;;  %v151_v53 = vld [vmem:[%s3770_s5 + $0x20] sm:$0xff] }
  0x27   :  { %364 = vmatpush.msrb.mxu0 %v88_v62  ;;  %417 = vmatpush.msrb.mxu2 %v81_v63  ;;  %v168_v51 = vld [vmem:[%s3770_s5 + $0xa8] sm:$0xff]  ;;  %v193_v52 = vld [vmem:[%s3770_s5 + $0x170] sm:$0xff]  ;;  %v167_v54 = vld [vmem:[%s3770_s5 + $0xa0] sm:$0xff] }
  0x28   :  { %443 = vmatpush.msrb.mxu3 %v82_v0  ;;  %2018 = vmatpush.msk.msrb.mxu1 %vm220_vm0, %v143_v15  ;;  %v192_v55 = vld [vmem:[%s3770_s5 + $0x168] sm:$0xff]  ;;  %v150_v56 = vld [vmem:[%s3770_s5 + $0x18] sm:$0xff]  ;;  %v191_v58 = vld [vmem:[%s3770_s5 + $0x160] sm:$0xff] }
  0x29   :  { %365 = vmatpush.msrb.mxu0 %v79_v2  ;;  %418 = vmatpush.msrb.mxu2 %v72_v3  ;;  %v166_v57 = vld [vmem:[%s3770_s5 + $0x98] sm:$0xff]  ;;  %v149_v59 = vld [vmem:[%s3770_s5 + $0x10] sm:$0xff]  ;;  %v148_v63 = vld [vmem:[%s3770_s5 + $0x8] sm:$0xff] }
  0x2a   :  { %444 = vmatpush.msrb.mxu3 %v73_v4  ;;  %385 = vmatpush.msrb.mxu1 %v134_v17  ;;  %v190_v61 = vld [vmem:[%s3770_s5 + $0x158] sm:$0xff]  ;;  %v164_v0 = vld [vmem:[%s3770_s5 + $0x88] sm:$0xff]  ;;  %v189_v1 = vld [vmem:[%s3770_s5 + $0x150] sm:$0xff] }
  0x2b   :  { %366 = vmatpush.msrb.mxu0 %v70_v5  ;;  %419 = vmatpush.msrb.mxu2 %v63_v6  ;;  %v147_v2 = vld [vmem:[%s3770_s5] sm:$0xff]  ;;  %v188_v4 = vld [vmem:[%s3770_s5 + $0x148] sm:$0xff]  ;;  %v182_v15 = vld [vmem:[%s3770_s5 + $0x118] sm:$0xff] }
  0x2c   :  { %445 = vmatpush.msrb.mxu3 %v64_v7  ;;  %2004 = vmatmul.msk.f32.gmra.mxu1 %vm210_vm1, %v2391_v46  ;;  %v163_v3 = vld [vmem:[%s3770_s5 + $0x80] sm:$0xff]  ;;  %v181_v17 = vld [vmem:[%s3770_s5 + $0x110] sm:$0xff] }
  0x2d   :  { %367 = vmatpush.msrb.mxu0 %v61_v8  ;;  %386 = vmatpush.msrb.mxu1 %v125_v19  ;;  %v187_v5 = vld [vmem:[%s3770_s5 + $0x140] sm:$0xff]  ;;  %v186_v8 = vld [vmem:[%s3770_s5 + $0x138] sm:$0xff] }
  0x2e   :  { %2015 = vmatmul.msk.f32.vlgmr.msrb.gmra.mxu0 %vm210_vm1, %v2341_v33  ;;  %2023 = vmatmul.msk.f32.vlgmr.msrb.gmra.mxu2 %vm210_vm1, %v2341_v33  ;;  %v179_v19 = vld [vmem:[%s3770_s5 + $0x100] sm:$0xff] }
  0x2f   :  { %2027 = vmatmul.msk.f32.vlgmr.msrb.gmra.mxu3 %vm210_vm1, %v2341_v33  ;;  %2030 = vmatpush.msk.msra.mxu0 %vm220_vm0, %v146_v9 }
  0x30   :  { %387 = vmatpush.msrb.mxu1 %v116_v21  ;;  %517 = vmatpush.msra.mxu2 %v178_v30 }
  0x31   :  { %463 = vmatpush.msra.mxu0 %v137_v10  ;;  %543 = vmatpush.msra.mxu3 %v194_v49  ;;  %v185_v10 = vld [vmem:[%s3770_s5 + $0x130] sm:$0xff] }
  0x32   :  { %388 = vmatpush.msrb.mxu1 %v107_v23  ;;  %518 = vmatpush.msra.mxu2 %v177_v32 }
  0x33   :  { %464 = vmatpush.msra.mxu0 %v128_v11  ;;  %544 = vmatpush.msra.mxu3 %v193_v52  ;;  %v184_v11 = vld [vmem:[%s3770_s5 + $0x128] sm:$0xff]  ;;  %v52_v52 = vld [vmem:[%s3771_s12 + $0x40] sm:$0xff] }
  0x34   :  { %2005 = vmatmul.msk.f32.gmra.mxu1 %vm210_vm1, %v2441_v60  ;;  %519 = vmatpush.msra.mxu2 %v176_v35 }
  0x35   :  { %465 = vmatpush.msra.mxu0 %v119_v12  ;;  %389 = vmatpush.msrb.mxu1 %v98_v24  ;;  %v183_v12 = vld [vmem:[%s3770_s5 + $0x120] sm:$0xff] }
  0x36   :  { %2016 = vmatmul.msk.f32.gmra.mxu0 %vm210_vm1, %v2391_v46  ;;  %2024 = vmatmul.msk.f32.gmra.mxu2 %vm210_vm1, %v2391_v46  ;;  %v2745_v24 = vld [vmem:[%s3771_s12] sm:$0xff] }
  0x37   :  { %2028 = vmatmul.msk.f32.gmra.mxu3 %vm210_vm1, %v2391_v46  ;;  %466 = vmatpush.msra.mxu0 %v110_v13 }
  0x38   :  { %390 = vmatpush.msrb.mxu1 %v89_v25  ;;  %520 = vmatpush.msra.mxu2 %v175_v36 }
  0x39   :  { %467 = vmatpush.msra.mxu0 %v101_v14  ;;  %545 = vmatpush.msra.mxu3 %v192_v55  ;;  %v209_v55 = vperm.slane %v52_v52, 0 }
  0x3a   :  { %391 = vmatpush.msrb.mxu1 %v80_v26  ;;  %521 = vmatpush.msra.mxu2 %v174_v38  ;;  %v50_v26 = vld [vmem:[%s3771_s12 + $0x30] sm:$0xff] }
  0x3b   :  { %468 = vmatpush.msra.mxu0 %v92_v16  ;;  %546 = vmatpush.msra.mxu3 %v191_v58  ;;  %v207_v30 = vperm.slane %v50_v26, 0 }
  0x3c   :  { %392 = vmatpush.msrb.mxu1 %v71_v27  ;;  %522 = vmatpush.msra.mxu2 %v173_v40  ;;  %v51_v27 = vld [vmem:[%s3771_s12 + $0x38] sm:$0xff] }
  0x3d   :  { %469 = vmatpush.msra.mxu0 %v83_v18  ;;  %547 = vmatpush.msra.mxu3 %v190_v61  ;;  %v180_v18 = vld [vmem:[%s3770_s5 + $0x108] sm:$0xff] }
  0x3e   :  { %2017 = vmatmul.msk.f32.gmra.mxu0 %vm210_vm1, %v2441_v60  ;;  %2025 = vmatmul.msk.f32.gmra.mxu2 %vm210_vm1, %v2441_v60 }
  0x3f   :  { %2029 = vmatmul.msk.f32.gmra.mxu3 %vm210_vm1, %v2441_v60  ;;  %470 = vmatpush.msra.mxu0 %v74_v20 }
  0x40   :  { %393 = vmatpush.msrb.mxu1 %v62_v28  ;;  %523 = vmatpush.msra.mxu2 %v172_v42 }
  0x41   :  { %471 = vmatpush.msra.mxu0 %v65_v22  ;;  %2019 = vmatmul.msk.f32.vlgmr.msrb.gmra.mxu1 %vm210_vm1, %v2341_v33  ;;  %v2740_v22 = vld [vmem:[%s3771_s12 + $0x8] sm:$0xff] }
  0x42   :  { %491 = vmatpush.msra.mxu1 %v162_v29  ;;  %524 = vmatpush.msra.mxu2 %v171_v44  ;;  %v202_v28 = vperm.slane %v2740_v22, 0  ;;  %v201_v29 = vperm.slane %v2745_v24, 0 }
  0x43   :  { %548 = vmatpush.msra.mxu3 %v189_v1 }
  0x44   :  { %492 = vmatpush.msra.mxu1 %v161_v31  ;;  %v208_v31 = vperm.slane %v51_v27, 0 }
  0x45   :  { %549 = vmatpush.msra.mxu3 %v188_v4 }
  0x46   :  { %2031 = vmatmul.msk.f32.vlgmr.msra.gmra.mxu0 %vm210_vm1, %v2341_v33  ;;  %v159_v33 = vld [vmem:[%s3770_s5 + $0x60] sm:$0xff]  ;;  %493 = vmatpush.msra.mxu1 %v160_v34 }
  0x47   :  { %550 = vmatpush.msra.mxu3 %v187_v5 }
  0x48   :  { %494 = vmatpush.msra.mxu1 %v159_v33 }
  0x49   :  { %2020 = vmatmul.msk.f32.gmra.mxu1 %vm210_vm1, %v2391_v46  ;;  %551 = vmatpush.msra.mxu3 %v186_v8 }
  0x4a   :  { %495 = vmatpush.msra.mxu1 %v158_v37 }
  0x4b   :  { %552 = vmatpush.msra.mxu3 %v185_v10 }
  0x4c   :  { %496 = vmatpush.msra.mxu1 %v157_v39 }
  0x4d   :  { %553 = vmatpush.msra.mxu3 %v184_v11 }
  0x4e   :  { %2032 = vmatmul.msk.f32.gmra.mxu0 %vm210_vm1, %v2391_v46  ;;  %497 = vmatpush.msra.mxu1 %v156_v41  ;;  %v170_v46 = vld [vmem:[%s3770_s5 + $0xb8] sm:$0xff] }
  0x4f   :  { %525 = vmatpush.msra.mxu2 %v170_v46  ;;  %554 = vmatpush.msra.mxu3 %v183_v12 }
  0x50   :  { %498 = vmatpush.msra.mxu1 %v155_v43 }
  0x51   :  { %2021 = vmatmul.msk.f32.gmra.mxu1 %vm210_vm1, %v2441_v60  ;;  %526 = vmatpush.msra.mxu2 %v169_v48 }
  0x52   :  { %499 = vmatpush.msra.mxu1 %v154_v45  ;;  %555 = vmatpush.msra.mxu3 %v182_v15 }
  0x53   :  { %527 = vmatpush.msra.mxu2 %v168_v51 }
  0x54   :  { %500 = vmatpush.msra.mxu1 %v153_v47  ;;  %556 = vmatpush.msra.mxu3 %v181_v17 }
  0x55   :  { %528 = vmatpush.msra.mxu2 %v167_v54 }
  0x56   :  { %2033 = vmatmul.msk.f32.gmra.mxu0 %vm210_vm1, %v2441_v60  ;;  %501 = vmatpush.msra.mxu1 %v152_v50  ;;  %v165_v60 = vld [vmem:[%s3770_s5 + $0x90] sm:$0xff] }
  0x57   :  { %529 = vmatpush.msra.mxu2 %v166_v57  ;;  %557 = vmatpush.msra.mxu3 %v180_v18  ;;  %v2764_v50 = vld [vmem:[%s3771_s12 + $0x10] sm:$0xff] }
  0x58   :  { %502 = vmatpush.msra.mxu1 %v151_v53  ;;  %v203_v54 = vperm.slane %v2764_v50, 0 }
  0x59   :  { %530 = vmatpush.msra.mxu2 %v165_v60  ;;  %558 = vmatpush.msra.mxu3 %v179_v19 }
  0x5a   :  { %503 = vmatpush.msra.mxu1 %v150_v56 }
  0x5b   :  { %531 = vmatpush.msra.mxu2 %v164_v0 }
  0x5c   :  { %504 = vmatpush.msra.mxu1 %v149_v59 }
  0x5d   :  { %532 = vmatpush.msra.mxu2 %v163_v3 }
  0x5e   :  { %505 = vmatpush.msra.mxu1 %v148_v63 }
  0x60   :  { %506 = vmatpush.msra.mxu1 %v147_v2 }
  0x92   :  { %v265_v62 = vpop.f32.mrf.mxu0 }
  0x93   :  { %v266_v35 = vadd.f32 %v265_v62, %v201_v29 }
  0x99   :  { %v2703_v6 = vpop.f32.mrf.mxu2  ;;  %v2705_v7 = vpop.f32.mrf.mxu3 }
  0x9a   :  { %v268_v9 = vpop.f32.mrf.mxu0  ;;  %v318_v63 = vadd.f32 %v2703_v6, %v203_v54 }
  0x9b   :  { %v269_v44 = vadd.f32 %v268_v9, %v201_v29 }
  0xa1   :  { %v2719_v13 = vpop.f32.mrf.mxu2  ;;  %v2721_v14 = vpop.f32.mrf.mxu3 }
  0xa2   :  { %v271_v16 = vpop.f32.mrf.mxu0  ;;  %v291_v23 = vpop.f32.mrf.mxu1  ;;  %v321_v5 = vadd.f32 %v2719_v13, %v203_v54 }
  0xa3   :  { %v292_v32 = vadd.f32 %v291_v23, %v202_v28  ;;  %v272_v58 = vadd.f32 %v271_v16, %v201_v29 }
  0xa9   :  { %v323_v20 = vpop.f32.mrf.mxu2  ;;  %v2735_v21 = vpop.f32.mrf.mxu3 }
  0xaa   :  { %v294_v40 = vpop.f32.mrf.mxu1  ;;  %v324_v11 = vadd.f32 %v323_v20, %v203_v54  ;;  %v198_v54 = vld [vmem:[%s3772_s6 + $0x18] sm:$0xf] }
  0xab   :  { %v2747_v25 = vpop.f32.mrf.mxu0  ;;  %v295_v42 = vadd.f32 %v294_v40, %v202_v28  ;;  %2034 = vmatpush.msk.msrb.mxu0 %vm607_vm4, %v198_v54 }
  0xb1   :  { %v421_v34 = vpop.f32.mrf.mxu2 }
  0xb2   :  { %v422_v33 = vadd.f32 %v421_v34, %v207_v30  ;;  %v447_v36 = vpop.f32.mrf.mxu3  ;;  %v297_v53 = vpop.f32.mrf.mxu1 }
  0xb3   :  { %v448_v37 = vadd.f32 %v447_v36, %v208_v31  ;;  %v2757_v38 = vpop.f32.mrf.mxu0  ;;  %v298_v56 = vadd.f32 %v297_v53, %v202_v28 }
  0xb4   :  { %v482_v39 = vmul.f32 %v422_v33, %v266_v35 }
  0xb5   :  { %v483_v41 = vmul.f32 %v448_v37, %v292_v32 }
  0xb6   :  { %507 = vmatmul.f32.vlgmr.msra.gmra.mxu1 %v482_v39 }
  0xb7   :  { %533 = vmatmul.f32.vlgmr.msra.gmra.mxu2 %v483_v41 }
  0xb9   :  { %v424_v43 = vpop.f32.mrf.mxu2 }
  0xba   :  { %v425_v45 = vadd.f32 %v424_v43, %v207_v30  ;;  %v450_v46 = vpop.f32.mrf.mxu3 }
  0xbb   :  { %v451_v47 = vadd.f32 %v450_v46, %v208_v31  ;;  %v2759_v48 = vpop.f32.mrf.mxu0 }
  0xbc   :  { %v485_v49 = vmul.f32 %v425_v45, %v269_v44 }
  0xbd   :  { %v486_v51 = vmul.f32 %v451_v47, %v295_v42 }
  0xbe   :  { %510 = vmatmul.f32.gmra.mxu1 %v485_v49  ;;  %v2772_v16 = vpop.f32.mrf.mxu1 }
  0xbf   :  { %536 = vmatmul.f32.gmra.mxu2 %v486_v51 }
  0xc1   :  { %v427_v57 = vpop.f32.mrf.mxu2 }
  0xc2   :  { %v428_v59 = vadd.f32 %v427_v57, %v207_v30  ;;  %v453_v60 = vpop.f32.mrf.mxu3  ;;  %v200_v57 = vld [vmem:[%s3772_s6 + $0x28] sm:$0xf] }
  0xc3   :  { %v454_v61 = vadd.f32 %v453_v60, %v208_v31  ;;  %v473_v62 = vpop.f32.mrf.mxu0  ;;  %2042 = vmatpush.msk.msrb.mxu2 %vm607_vm4, %v200_v57  ;;  %v2156_v57 = vmov 0.0  }
  0xc4   :  { %v474_v0 = vadd.f32 %v473_v62, %v209_v55  ;;  %v488_v1 = vmul.f32 %v428_v59, %v272_v58  ;;  %v196_v58 = vld [vmem:[%s3772_s6 + $0x8] sm:$0xff]  ;;  %v197_v59 = vld [vmem:[%s3772_s6 + $0x10] sm:$0xff] }
  0xc5   :  { %v489_v2 = vmul.f32 %v454_v61, %v298_v56  ;;  %v195_v56 = vld [vmem:[%s3772_s6] sm:$0xff]  ;;  %684 = vmatpush.msrb.mxu2 %v197_v59 }
  0xc6   :  { %v484_v3 = vmul.f32 %v474_v0, %v318_v63  ;;  %513 = vmatmul.f32.gmra.mxu1 %v488_v1  ;;  %v2774_v6 = vpop.f32.mrf.mxu1  ;;  %632 = vmatpush.msrb.mxu0 %v195_v56 }
  0xc7   :  { %539 = vmatmul.f32.gmra.mxu2 %v489_v2 }
  0xc8   :  { %559 = vmatmul.f32.vlgmr.msra.gmra.mxu3 %v484_v3 }
  0xcb   :  { %v476_v4 = vpop.f32.mrf.mxu0 }
  0xcc   :  { %v477_v8 = vadd.f32 %v476_v4, %v209_v55 }
  0xce   :  { %v487_v9 = vmul.f32 %v477_v8, %v321_v5  ;;  %v2776_v17 = vpop.f32.mrf.mxu1  ;;  %v893_v8 = vld [vmem:[%s3773_s4 + $0xc0] sm:$0xff] }
  0xcf   :  { %957 = vmatpush.msra.mxu2 %v893_v8  ;;  %v889_v8 = vld [vmem:[%s3773_s4 + $0xa0] sm:$0xff] }
  0xd0   :  { %562 = vmatmul.f32.gmra.mxu3 %v487_v9  ;;  %v887_v9 = vld [vmem:[%s3773_s4 + $0x90] sm:$0xff] }
  0xd1   :  { %958 = vmatpush.msra.mxu2 %v887_v9  ;;  %v898_v9 = vld [vmem:[%s3773_s4 + $0xe8] sm:$0xff] }
  0xd3   :  { %v479_v10 = vpop.f32.mrf.mxu0 }
  0xd4   :  { %v480_v12 = vadd.f32 %v479_v10, %v209_v55  ;;  %v199_v55 = vld [vmem:[%s3772_s6 + $0x20] sm:$0xf]  ;;  %s2159_s6 = smov 64  }
  0xd5   :  { %2089 = vmatpush.msk.msrb.mxu1 %vm607_vm4, %v199_v55  ;;  %2038 = vmatpush.msk.msra.mxu0 %vm607_vm4, %v199_v55  ;;  %v881_v10 = vld [vmem:[%s3773_s4 + $0x60] sm:$0xff] }
  0xd6   :  { %v490_v15 = vmul.f32 %v480_v12, %v324_v11  ;;  %959 = vmatpush.msra.mxu2 %v881_v10  ;;  %v875_v11 = vld [vmem:[%s3773_s4 + $0x30] sm:$0xff]  ;;  %v704_v12 = vlaneseq }
  0xd7   :  { %2090 = vmatpush.msrb.mxu1 %v196_v58  ;;  %658 = vmatpush.msra.mxu0 %v196_v58  ;;  %v883_v10 = vld [vmem:[%s3773_s4 + $0x70] sm:$0xff] }
  0xd8   :  { %565 = vmatmul.f32.gmra.mxu3 %v490_v15  ;;  %960 = vmatpush.msra.mxu2 %v875_v11  ;;  %v892_v11 = vld [vmem:[%s3773_s4 + $0xb8] sm:$0xff] }
 0x133   :  { %v508_v19 = vpop.f32.mrf.mxu1 }
 0x13a   :  { %v534_v18 = vpop.f32.mrf.mxu2 }
 0x13b   :  { %v511_v27 = vpop.f32.mrf.mxu1  ;;  %v535_v29 = vadd.f32 %v534_v18, %v508_v19  ;;  %v869_v18 = vld [vmem:[%s3773_s4] sm:$0xff] }
 0x13c   :  { %961 = vmatpush.msra.mxu2 %v869_v18  ;;  %v2831_v19 = vld [vmem:[%s3774_s2] sm:$0xff]  ;;  %v874_v18 = vld [vmem:[%s3773_s4 + $0x28] sm:$0xff] }
 0x142   :  { %v537_v26 = vpop.f32.mrf.mxu2 }
 0x143   :  { %v538_v13 = vadd.f32 %v537_v26, %v511_v27  ;;  %v514_v34 = vpop.f32.mrf.mxu1 }
 0x14a   :  { %v540_v20 = vpop.f32.mrf.mxu2 }
 0x14b   :  { %v560_v23 = vpop.f32.mrf.mxu3  ;;  %v541_v35 = vadd.f32 %v540_v20, %v514_v34  ;;  %v891_v20 = vld [vmem:[%s3773_s4 + $0xb0] sm:$0xff] }
 0x14c   :  { %v561_v31 = vadd.f32 %v560_v23, %v535_v29  ;;  %v2835_v23 = vshrl.u32 %v704_v12, 7  ;;  %v2850_v29 = vld [vmem:[%s3771_s12 + $0x18] sm:$0xff] }
 0x14e   :  { %v569_v33 = vmul.f32 0.17677669, %v561_v31  ;;  %v2840_v27 = vadd.s32 1, %v2835_v23  ;;  %v2857_v31 = vld [vmem:[%s3774_s2 + $0x8] sm:$0x3]  ;;  %v708_v34 = vmul.u32 10, %v2835_v23 }
 0x150   :  { %v573_v41 = vsel %vm572_vm2, %v569_v33, -inf }
 0x153   :  { %v563_v28 = vpop.f32.mrf.mxu3 }
 0x154   :  { %v564_v30 = vadd.f32 %v563_v28, %v538_v13  ;;  %v897_v28 = vld [vmem:[%s3773_s4 + $0xe0] sm:$0xff] }
 0x156   :  { %v570_v32 = vmul.f32 0.17677669, %v564_v30 }
 0x158   :  { %v574_v39 = vsel %vm572_vm2, %v570_v32, -inf }
 0x159   :  { %v577_v42 = vmax.f32 %v573_v41, %v574_v39  ;;  %v879_v39 = vld [vmem:[%s3773_s4 + $0x50] sm:$0xff]  ;;  %v2879_v41 = vld [vmem:[%s3771_s12 + $0x20] sm:$0xff] }
 0x15b   :  { %v566_v36 = vpop.f32.mrf.mxu3 }
 0x15c   :  { %v567_v37 = vadd.f32 %v566_v36, %v541_v35  ;;  %v711_v35 = vmul.u32 10, %v2840_v27  ;;  %v204_v36 = vperm.slane %v2850_v29, 0 }
 0x15e   :  { %v571_v40 = vmul.f32 0.17677669, %v567_v37 }
 0x160   :  { %v576_v43 = vsel %vm575_vm3, %v571_v40, -inf }
 0x161   :  { %v578_v44 = vmax.f32 %v577_v42, %v576_v43  ;;  %v878_v42 = vld [vmem:[%s3773_s4 + $0x48] sm:$0xff]  ;;  %v872_v43 = vld [vmem:[%s3773_s4 + $0x18] sm:$0xff] }
 0x163   :  { %579 = vmax.xlane.f32.xlu0 %v578_v44  ;;  %v2894_v44 = vld [vmem:[%s3771_s12 + $0x28] sm:$0xff] }
 0x1d6   :  { %v580_v45 = vpop.xlane.xlu0 %579 }
 0x1d7   :  { %v581_v46 = vrot.slane %v580_v45, 4 }
 0x1d9   :  { %v582_v47 = vmax.f32 %v580_v45, %v581_v46  ;;  %v873_v45 = vld [vmem:[%s3773_s4 + $0x20] sm:$0xff]  ;;  %v347_v46 = vadd.f32 %v2721_v14, %v204_v36 }
 0x1db   :  { %v583_v49 = vrot.slane %v582_v47, 2 }
 0x1dd   :  { %v584_v51 = vmax.f32 %v582_v47, %v583_v49  ;;  %v205_v49 = vperm.slane %v2879_v41, 0 }
 0x1df   :  { %v585_v52 = vrot.slane %v584_v51, 1  ;;  %v376_v14 = vadd.f32 %v2759_v48, %v205_v49  ;;  %v370_v58 = vadd.f32 %v2747_v25, %v205_v49  ;;  %v373_v59 = vadd.f32 %v2757_v38, %v205_v49  ;;  %v894_v38 = vld [vmem:[%s3773_s4 + $0xc8] sm:$0xff]  ;;  %v929_v49 = vld [vmem:[%s3775_s7 + $0xf0] sm:$0xff] }
 0x1e1   :  { %v586_v53 = vmax.f32 %v584_v51, %v585_v52  ;;  %v344_v51 = vadd.f32 %v2705_v7, %v204_v36  ;;  %v206_v52 = vperm.slane %v2894_v44, 0 }
 0x1e3   :  { %2091 = vpush %v586_v53  ;;  %v402_v55 = vadd.f32 %v2776_v17, %v206_v52  ;;  %v396_v48 = vadd.f32 %v2772_v16, %v206_v52  ;;  %v888_v16 = vld [vmem:[%s3773_s4 + $0x98] sm:$0xff] }
 0x214   :  { %s2092_s25 = spop %2091 }
 0x215   :  { %v588_v60 = vstv %s2092_s25  ;;  %s2164_s25 = smov 65  }
 0x216   :  { %v589_v61 = vsub.f32 %v569_v33, %v588_v60  ;;  %v590_v62 = vsub.f32 %v570_v32, %v588_v60  ;;  %v591_v1 = vsub.f32 %v571_v40, %v588_v60  ;;  %v2862_v32 = vand.u32 127, %v704_v12  ;;  %v885_v33 = vld [vmem:[%s3773_s4 + $0x80] sm:$0xff]  ;;  %v886_v12 = vld [vmem:[%s3773_s4 + $0x88] sm:$0xff] }
 0x217   :  { %v350_v40 = vadd.f32 %v2735_v21, %v204_v36  ;;  %v910_v36 = vld [vmem:[%s3775_s7 + $0x58] sm:$0xff] }
 0x218   :  { %v592_v63 = vmul.f32 1.442695, %v589_v61  ;;  %v594_v0 = vmul.f32 1.442695, %v590_v62  ;;  %v596_v2 = vmul.f32 1.442695, %v591_v1  ;;  %vm2882_vm6 = vcmp.ge.s32.totalorder %v2862_v32, %v708_v34 }
 0x219   :  { %vm2887_vm7 = vcmp.lt.s32.totalorder %v2862_v32, %v711_v35  ;;  %v399_v61 = vadd.f32 %v2774_v6, %v206_v52  ;;  %v882_v6 = vld [vmem:[%s3773_s4 + $0x68] sm:$0xff] }
 0x21a   :  { %2106 = vpow2.f32 %v592_v63  ;;  %vm713_vm8 = vmand %vm2882_vm6, %vm2887_vm7  ;;  %v890_v34 = vld [vmem:[%s3773_s4 + $0xa8] sm:$0xff] }
 0x21b   :  { %2108 = vpow2.f32 %v594_v0  ;;  %v2046_v7 = vsel %vm713_vm8, 1.0, %v2156_v57  ;;  %v912_v35 = vld [vmem:[%s3775_s7 + $0x68] sm:$0xff] }
 0x21c   :  { %2110 = vpow2.f32 %v596_v2  ;;  %v928_v52 = vld [vmem:[%s3775_s7 + $0xe8] sm:$0xff] }
 0x220   :  { %v2107_v3 = vpop.eup %2106 }
 0x221   :  { %v2109_v4 = vpop.eup %2108  ;;  %2035 = vmatmul.msk.f32.vlgmr.msrb.gmra.mxu0 %vm572_vm2, %v2107_v3  ;;  %2043 = vmatmul.msk.f32.vlgmr.msrb.gmra.mxu2 %vm572_vm2, %v2107_v3 }
 0x222   :  { %2040 = vmatmul.msk.f32.vlgmr.msrb.gmra.mxu1 %vm572_vm2, %v2109_v4  ;;  %v2111_v5 = vpop.eup %2110  ;;  %1049 = vmatpush.msrb.mxu2 %v897_v28  ;;  %v914_v28 = vld [vmem:[%s3775_s7 + $0x78] sm:$0xff] }
 0x224   :  { %1050 = vmatpush.msrb.mxu2 %v891_v20  ;;  %v913_v20 = vld [vmem:[%s3775_s7 + $0x70] sm:$0xff] }
 0x226   :  { %1051 = vmatpush.msrb.mxu2 %v885_v33  ;;  %v911_v33 = vld [vmem:[%s3775_s7 + $0x60] sm:$0xff] }
 0x228   :  { %1052 = vmatpush.msrb.mxu2 %v879_v39  ;;  %v884_v39 = vld [vmem:[%s3773_s4 + $0x78] sm:$0xff] }
 0x229   :  { %2036 = vmatmul.msk.f32.gmra.mxu0 %vm572_vm2, %v2109_v4  ;;  %2044 = vmatmul.msk.f32.gmra.mxu2 %vm572_vm2, %v2109_v4  ;;  %v870_v4 = vld [vmem:[%s3773_s4 + $0x8] sm:$0xff] }
 0x22a   :  { %2041 = vmatmul.msk.f32.gmra.mxu1 %vm572_vm2, %v2111_v5  ;;  %1053 = vmatpush.msrb.mxu2 %v873_v45  ;;  %v930_v45 = vld [vmem:[%s3775_s7 + $0xf8] sm:$0xff] }
 0x231   :  { %2037 = vmatmul.msk.f32.gmra.mxu0 %vm572_vm2, %v2111_v5  ;;  %2045 = vmatmul.msk.f32.gmra.mxu2 %vm572_vm2, %v2111_v5  ;;  %v895_v5 = vld [vmem:[%s3773_s4 + $0xd0] sm:$0xff] }
 0x239   :  { %2039 = vmatmul.msk.f32.vlgmr.msra.gmra.mxu0 %vm572_vm2, %v2107_v3  ;;  %2059 = vmatmul.msk.f32.vlgmr.msra.gmra.mxu2 %vm939_vm5, %v2831_v19  ;;  %v876_v3 = vld [vmem:[%s3773_s4 + $0x38] sm:$0xff] }
 0x241   :  { %2060 = vmatmul.msk.f32.gmra.mxu2 %vm939_vm5, %v2857_v31 }
 0x249   :  { %2067 = vmatmul.msk.f32.vlgmr.msrb.gmra.mxu2 %vm939_vm5, %v2831_v19 }
 0x251   :  { %2068 = vmatmul.msk.f32.gmra.mxu2 %vm939_vm5, %v2857_v31 }
 0x29e   :  { %v2823_v15 = vpop.f32.mrf.mxu0 }
 0x29f   :  { %v2852_v30 = vpop.f32.mrf.mxu1  ;;  %v695_v56 = vmul.f32 %v2823_v15, %v344_v51  ;;  %v905_v51 = vld [vmem:[%s3775_s7 + $0x30] sm:$0xff] }
 0x2a0   :  { %v699_v0 = vmul.f32 %v2852_v30, %v373_v59  ;;  %v937_v59 = vperm.slane %v2879_v41, 1  ;;  %v900_v41 = vld [vmem:[%s3775_s7 + $0x8] sm:$0xff] }
 0x2a4   :  { %v2837_v26 = vpop.f32.mrf.mxu2 }
 0x2a5   :  { %v697_v25 = vmul.f32 %v2837_v26, %v396_v48 }
 0x2a6   :  { %v2842_v13 = vpop.f32.mrf.mxu0 }
 0x2a7   :  { %v698_v53 = vmul.f32 %v2842_v13, %v347_v46  ;;  %v666_v54 = vpop.f32.mrf.mxu1  ;;  %v907_v46 = vld [vmem:[%s3775_s7 + $0x40] sm:$0xff] }
 0x2a8   :  { %v702_v62 = vmul.f32 %v666_v54, %v376_v14  ;;  %v904_v14 = vld [vmem:[%s3775_s7 + $0x28] sm:$0xff] }
 0x2ac   :  { %v689_v37 = vpop.f32.mrf.mxu2 }
 0x2ad   :  { %v700_v1 = vmul.f32 %v689_v37, %v399_v61 }
 0x2ae   :  { %v640_v21 = vpop.f32.mrf.mxu0 }
 0x2af   :  { %v701_v47 = vmul.f32 %v640_v21, %v350_v40 }
 0x2b1   :  { %2047 = vmatpush.msk.msrb.mxu3 %vm607_vm4, %v701_v47  ;;  %v906_v47 = vld [vmem:[%s3775_s7 + $0x38] sm:$0xff] }
 0x2b3   :  { %752 = vmatpush.msrb.mxu3 %v698_v53 }
 0x2b4   :  { %v692_v60 = vpop.f32.mrf.mxu2 }
 0x2b5   :  { %v703_v63 = vmul.f32 %v692_v60, %v402_v55  ;;  %753 = vmatpush.msrb.mxu3 %v695_v56  ;;  %2057 = vmatpush.msk.msra.mxu1 %vm607_vm4, %v692_v60  ;;  %v903_v55 = vld [vmem:[%s3775_s7 + $0x20] sm:$0xff]  ;;  %v933_v56 = vperm.slane %v2745_v24, 1  ;;  %v901_v60 = vld [vmem:[%s3775_s7 + $0x10] sm:$0xff] }
 0x2b6   :  { %v660_v17 = vpop.f32.mrf.mxu0  ;;  %2048 = vmatmul.msk.f32.vlgmr.msrb.gmra.mxu3 %vm716_vm9, %v2046_v7 }
 0x2b7   :  { %v696_v2 = vmul.f32 %v660_v17, %v370_v58  ;;  %2049 = vmatpush.msk.msra.mxu3 %vm607_vm4, %v702_v62  ;;  %2051 = vmatpush.msk.msrb.mxu0 %vm607_vm4, %v703_v63  ;;  %v925_v58 = vld [vmem:[%s3775_s7 + $0xd0] sm:$0xff]  ;;  %v924_v62 = vld [vmem:[%s3775_s7 + $0xc8] sm:$0xff]  ;;  %v923_v63 = vld [vmem:[%s3775_s7 + $0xc0] sm:$0xff] }
 0x2b8   :  { %852 = vmatpush.msra.mxu1 %v689_v37  ;;  %v909_v37 = vld [vmem:[%s3775_s7 + $0x50] sm:$0xff] }
 0x2b9   :  { %772 = vmatpush.msra.mxu3 %v699_v0  ;;  %792 = vmatpush.msrb.mxu0 %v700_v1  ;;  %v922_v1 = vld [vmem:[%s3775_s7 + $0xb8] sm:$0xff] }
 0x2ba   :  { %853 = vmatpush.msra.mxu1 %v2837_v26  ;;  %v877_v26 = vld [vmem:[%s3773_s4 + $0x40] sm:$0xff] }
 0x2bb   :  { %773 = vmatpush.msra.mxu3 %v696_v2  ;;  %793 = vmatpush.msrb.mxu0 %v697_v25  ;;  %v921_v25 = vld [vmem:[%s3775_s7 + $0xb0] sm:$0xff] }
 0x2bc   :  { %2052 = vmatmul.msk.f32.vlgmr.msrb.gmra.mxu0 %vm716_vm9, %v2046_v7  ;;  %2058 = vmatmul.msk.f32.vlgmr.msra.gmra.mxu1 %vm716_vm9, %v2046_v7  ;;  %v963_v40 = vpop.f32.mrf.mxu2 }
 0x2bd   :  { %2053 = vmatpush.msk.msrb.mxu3 %vm607_vm4, %v640_v21  ;;  %2055 = vmatpush.msk.msra.mxu0 %vm607_vm4, %v666_v54  ;;  %v908_v21 = vld [vmem:[%s3775_s7 + $0x48] sm:$0xff]  ;;  %v927_v54 = vld [vmem:[%s3775_s7 + $0xe0] sm:$0xff]  ;;  %v964_v61 = vadd.f32 %v963_v40, %v933_v56  ;;  %v934_v40 = vperm.slane %v2740_v22, 1 }
 0x2be   :  { %2050 = vmatmul.msk.f32.vlgmr.msra.gmra.mxu3 %vm716_vm9, %v2046_v7 }
 0x2bf   :  { %812 = vmatpush.msrb.mxu3 %v2842_v13  ;;  %832 = vmatpush.msra.mxu0 %v2852_v30  ;;  %v871_v13 = vld [vmem:[%s3773_s4 + $0x10] sm:$0xff]  ;;  %v896_v30 = vld [vmem:[%s3773_s4 + $0xd8] sm:$0xff] }
 0x2c0   :  { %1026 = vmatpush.msrb.mxu1 %v896_v30 }
 0x2c1   :  { %813 = vmatpush.msrb.mxu3 %v2823_v15  ;;  %833 = vmatpush.msra.mxu0 %v660_v17  ;;  %v880_v15 = vld [vmem:[%s3773_s4 + $0x58] sm:$0xff] }
 0x2c2   :  { %1027 = vmatpush.msrb.mxu1 %v890_v34 }
 0x2c3   :  { %980 = vmatpush.msra.mxu3 %v894_v38  ;;  %1003 = vmatpush.msrb.mxu0 %v895_v5  ;;  %v920_v38 = vld [vmem:[%s3775_s7 + $0xa8] sm:$0xff]  ;;  %v918_v5 = vld [vmem:[%s3775_s7 + $0x98] sm:$0xff] }
 0x2c4   :  { %2056 = vmatmul.msk.f32.vlgmr.msra.gmra.mxu0 %vm716_vm9, %v2046_v7  ;;  %1028 = vmatpush.msrb.mxu1 %v884_v39  ;;  %v966_v53 = vpop.f32.mrf.mxu2 }
 0x2c5   :  { %981 = vmatpush.msra.mxu3 %v888_v16  ;;  %1004 = vmatpush.msrb.mxu0 %v889_v8  ;;  %v967_v16 = vadd.f32 %v966_v53, %v933_v56  ;;  %v2157_v53 = vmov 128.0  }
 0x2c6   :  { %2054 = vmatmul.msk.f32.vlgmr.msrb.gmra.mxu3 %vm716_vm9, %v2046_v7  ;;  %1029 = vmatpush.msrb.mxu1 %v878_v42  ;;  %v902_v7 = vld [vmem:[%s3775_s7 + $0x18] sm:$0xff]  ;;  %v938_v42 = vperm.slane %v2894_v44, 1 }
 0x2c7   :  { %982 = vmatpush.msra.mxu3 %v882_v6  ;;  %1005 = vmatpush.msrb.mxu0 %v883_v10  ;;  %v919_v6 = vld [vmem:[%s3775_s7 + $0xa0] sm:$0xff] }
 0x2c8   :  { %1030 = vmatpush.msrb.mxu1 %v872_v43 }
 0x2c9   :  { %983 = vmatpush.msra.mxu3 %v876_v3  ;;  %1006 = vmatpush.msrb.mxu0 %v877_v26 }
 0x2ca   :  { %1111 = vmatpush.msra.mxu1 %v930_v45 }
 0x2cb   :  { %984 = vmatpush.msra.mxu3 %v870_v4  ;;  %1007 = vmatpush.msrb.mxu0 %v871_v13 }
 0x2cc   :  { %2063 = vmatmul.msk.f32.vlgmr.msrb.gmra.mxu0 %vm939_vm5, %v2831_v19  ;;  %2065 = vmatmul.msk.f32.vlgmr.msrb.gmra.mxu1 %vm939_vm5, %v2831_v19  ;;  %v1055_v48 = vpop.f32.mrf.mxu2 }
 0x2cd   :  { %1072 = vmatpush.msrb.mxu3 %v898_v9  ;;  %1088 = vmatpush.msra.mxu0 %v914_v28  ;;  %v1056_v17 = vadd.f32 %v1055_v48, %v937_v59 }
 0x2ce   :  { %2061 = vmatmul.msk.f32.vlgmr.msra.gmra.mxu3 %vm939_vm5, %v2831_v19  ;;  %1112 = vmatpush.msra.mxu1 %v929_v49 }
 0x2cf   :  { %1073 = vmatpush.msrb.mxu3 %v892_v11  ;;  %1089 = vmatpush.msra.mxu0 %v913_v20  ;;  %v1084_v0 = vmul.f32 %v1056_v17, %v964_v61  ;;  %v917_v11 = vld [vmem:[%s3775_s7 + $0x90] sm:$0xff] }
 0x2d0   :  { %1113 = vmatpush.msra.mxu1 %v928_v52 }
 0x2d1   :  { %1074 = vmatpush.msrb.mxu3 %v886_v12  ;;  %1090 = vmatpush.msra.mxu0 %v912_v35  ;;  %v916_v12 = vld [vmem:[%s3775_s7 + $0x88] sm:$0xff] }
 0x2d2   :  { %1114 = vmatpush.msra.mxu1 %v927_v54 }
 0x2d3   :  { %1075 = vmatpush.msrb.mxu3 %v880_v15  ;;  %1091 = vmatpush.msra.mxu0 %v911_v33  ;;  %v915_v15 = vld [vmem:[%s3775_s7 + $0x80] sm:$0xff] }
 0x2d4   :  { %2064 = vmatmul.msk.f32.gmra.mxu0 %vm939_vm5, %v2857_v31  ;;  %2066 = vmatmul.msk.f32.gmra.mxu1 %vm939_vm5, %v2857_v31  ;;  %v1058_v3 = vpop.f32.mrf.mxu2 }
 0x2d5   :  { %1076 = vmatpush.msrb.mxu3 %v874_v18  ;;  %1092 = vmatpush.msra.mxu0 %v910_v36  ;;  %v1059_v4 = vadd.f32 %v1058_v3, %v937_v59 }
 0x2d6   :  { %2062 = vmatmul.msk.f32.gmra.mxu3 %vm939_vm5, %v2857_v31 }
 0x2d7   :  { %1093 = vmatpush.msra.mxu0 %v909_v37  ;;  %v1086_v9 = vmul.f32 %v1059_v4, %v967_v16 }
 0x2d9   :  { %1094 = vmatpush.msra.mxu0 %v908_v21 }
 0x2db   :  { %1095 = vmatpush.msra.mxu0 %v907_v46 }
 0x2dd   :  { %1096 = vmatpush.msra.mxu0 %v906_v47 }
 0x2de   :  { %2069 = vmatmul.msk.f32.vlgmr.msrb.gmra.mxu3 %vm939_vm5, %v2831_v19  ;;  %v926_v19 = vld [vmem:[%s3775_s7 + $0xd8] sm:$0xff] }
 0x2df   :  { %1097 = vmatpush.msra.mxu0 %v905_v51  ;;  %1115 = vmatpush.msra.mxu1 %v926_v19 }
 0x2e1   :  { %1098 = vmatpush.msra.mxu0 %v904_v14  ;;  %1116 = vmatpush.msra.mxu1 %v925_v58 }
 0x2e3   :  { %1099 = vmatpush.msra.mxu0 %v903_v55  ;;  %1117 = vmatpush.msra.mxu1 %v924_v62 }
 0x2e5   :  { %1100 = vmatpush.msra.mxu0 %v902_v7  ;;  %1118 = vmatpush.msra.mxu1 %v923_v63 }
 0x2e6   :  { %2070 = vmatmul.msk.f32.gmra.mxu3 %vm939_vm5, %v2857_v31  ;;  %v899_v31 = vld [vmem:[%s3775_s7] sm:$0xff]  ;;  %vm1220_vm5 = vcmask 80896  }
 0x2e7   :  { %1101 = vmatpush.msra.mxu0 %v901_v60  ;;  %1119 = vmatpush.msra.mxu1 %v922_v1 }
 0x2e9   :  { %1102 = vmatpush.msra.mxu0 %v900_v41  ;;  %1120 = vmatpush.msra.mxu1 %v921_v25 }
 0x2eb   :  { %1103 = vmatpush.msra.mxu0 %v899_v31  ;;  %1121 = vmatpush.msra.mxu1 %v920_v38 }
 0x2ec   :  { %1104 = vmatmul.f32.vlgmr.msra.gmra.mxu0 %v1084_v0 }
 0x2ed   :  { %1122 = vmatpush.msra.mxu1 %v919_v6 }
 0x2ef   :  { %1123 = vmatpush.msra.mxu1 %v918_v5  ;;  %v932_v5 = vld [vmem:[%s3776_s8 + $0x8] sm:$0xff] }
 0x2f0   :  { %1201 = vmatpush.msra.mxu3 %v932_v5 }
 0x2f1   :  { %1124 = vmatpush.msra.mxu1 %v917_v11 }
 0x2f3   :  { %1125 = vmatpush.msra.mxu1 %v916_v12 }
 0x2f4   :  { %1107 = vmatmul.f32.gmra.mxu0 %v1086_v9  ;;  %v1480_v9 = vld [vmem:[%s3777_s9 + $0x78] sm:$0xff] }
 0x2f5   :  { %1126 = vmatpush.msra.mxu1 %v915_v15  ;;  %1578 = vmatpush.msrb.mxu3 %v1480_v9 }
 0x339   :  { %v755_v2 = vpop.f32.mrf.mxu3  ;;  %v3103_v8 = vpop.f32.mrf.mxu0 }
 0x33a   :  { %v3121_v56 = vpop.f32.mrf.mxu1 }
 0x341   :  { %v775_v10 = vpop.f32.mrf.mxu3  ;;  %v835_v18 = vpop.f32.mrf.mxu0 }
 0x342   :  { %v859_v28 = vmax.f32 %v835_v18, 1e-30 }
 0x349   :  { %v815_v26 = vpop.f32.mrf.mxu3  ;;  %v3128_v60 = vpop.f32.mrf.mxu0 }
 0x34a   :  { %v858_v13 = vmax.f32 %v815_v26, 1e-30  ;;  %v3132_v62 = vpop.f32.mrf.mxu1 }
 0x34c   :  { %2112 = vrcp.f32 %v858_v13 }
 0x34d   :  { %2114 = vrcp.f32 %v859_v28 }
 0x34e   :  { %2116 = vrcp.f32 %v2157_v53  ;;  %v1467_v53 = vld [vmem:[%s3777_s9 + $0x10] sm:$0xff] }
 0x351   :  { %v986_v30 = vpop.f32.mrf.mxu3  ;;  %v3135_v48 = vpop.f32.mrf.mxu0 }
 0x352   :  { %v2113_v20 = vpop.eup %2112  ;;  %v987_v21 = vadd.f32 %v986_v30, %v934_v40  ;;  %v3137_v41 = vpop.f32.mrf.mxu1  ;;  %v1479_v30 = vld [vmem:[%s3777_s9 + $0x70] sm:$0xff] }
 0x353   :  { %v864_v34 = vmul.f32 %v2113_v20, %v755_v2  ;;  %v2115_v33 = vpop.eup %2114  ;;  %1579 = vmatpush.msrb.mxu3 %v1479_v30  ;;  %v1478_v20 = vld [vmem:[%s3777_s9 + $0x68] sm:$0xff] }
 0x354   :  { %v3115_v37 = vmul.f32 %v2115_v33, %v775_v10  ;;  %v2117_v14 = vpop.eup %2116  ;;  %v1476_v33 = vld [vmem:[%s3777_s9 + $0x58] sm:$0xff] }
 0x355   :  { %v1323_v35 = vsel %vm1224_vm10, %v864_v34, 0.0  ;;  %v1327_v54 = vmul.f32 128.0, %v2117_v14  ;;  %vm1331_vm11 = vweird.f32 %v2117_v14  ;;  %1580 = vmatpush.msrb.mxu3 %v1478_v20 }
 0x356   :  { %1324 = vadd.xlane.f32.xlu1 %v1323_v35  ;;  %v1352_v39 = vsel %vm1224_vm10, %v3115_v37, 0.0  ;;  %v1477_v35 = vld [vmem:[%s3777_s9 + $0x60] sm:$0xff] }
 0x357   :  { %v1328_v19 = vsub.f32 1.0, %v1327_v54  ;;  %1581 = vmatpush.msrb.mxu3 %v1477_v35  ;;  %v1466_v54 = vld [vmem:[%s3777_s9 + $0x8] sm:$0xff] }
 0x359   :  { %v989_v36 = vpop.f32.mrf.mxu3  ;;  %v1329_v55 = vmul.f32 %v2117_v14, %v1328_v19  ;;  %1582 = vmatpush.msrb.mxu3 %v1476_v33  ;;  %v1465_v19 = vld [vmem:[%s3777_s9] sm:$0xff] }
 0x35a   :  { %v990_v49 = vadd.f32 %v989_v36, %v934_v40  ;;  %v931_v40 = vld [vmem:[%s3776_s8] sm:$0xff] }
 0x35b   :  { %v1330_v22 = vadd.f32 %v2117_v14, %v1329_v55  ;;  %1178 = vmatpush.msra.mxu2 %v931_v40 }
 0x35d   :  { %v3123_v44 = vsel %vm1331_vm11, %v2117_v14, %v1330_v22 }
 0x35e   :  { %1353 = vadd.xlane.f32.xlu1 %v1352_v39  ;;  %v1475_v39 = vld [vmem:[%s3777_s9 + $0x50] sm:$0xff] }
 0x35f   :  { %1583 = vmatpush.msrb.mxu3 %v1475_v39 }
 0x361   :  { %v1078_v43 = vpop.f32.mrf.mxu3 }
 0x362   :  { %v1079_v45 = vadd.f32 %v1078_v43, %v938_v42  ;;  %v1473_v43 = vld [vmem:[%s3777_s9 + $0x40] sm:$0xff] }
 0x364   :  { %v1085_v46 = vmul.f32 %v1079_v45, %v987_v21  ;;  %v1472_v45 = vld [vmem:[%s3777_s9 + $0x38] sm:$0xff] }
 0x366   :  { %1127 = vmatmul.f32.vlgmr.msra.gmra.mxu1 %v1085_v46  ;;  %v1471_v46 = vld [vmem:[%s3777_s9 + $0x30] sm:$0xff] }
 0x369   :  { %v1081_v47 = vpop.f32.mrf.mxu3  ;;  %v1105_v17 = vpop.f32.mrf.mxu0 }
 0x36a   :  { %v1082_v51 = vadd.f32 %v1081_v47, %v938_v42  ;;  %v1474_v42 = vld [vmem:[%s3777_s9 + $0x48] sm:$0xff] }
 0x36b   :  { %1584 = vmatpush.msrb.mxu3 %v1474_v42  ;;  %v1470_v47 = vld [vmem:[%s3777_s9 + $0x28] sm:$0xff] }
 0x36c   :  { %v1087_v52 = vmul.f32 %v1082_v51, %v990_v49  ;;  %v1469_v49 = vld [vmem:[%s3777_s9 + $0x20] sm:$0xff] }
 0x36d   :  { %1585 = vmatpush.msrb.mxu3 %v1473_v43 }
 0x36e   :  { %1130 = vmatmul.f32.gmra.mxu1 %v1087_v52  ;;  %v1468_v52 = vld [vmem:[%s3777_s9 + $0x18] sm:$0xff] }
 0x36f   :  { %1586 = vmatpush.msrb.mxu3 %v1472_v45 }
 0x371   :  { %v1108_v1 = vpop.f32.mrf.mxu0  ;;  %1587 = vmatpush.msrb.mxu3 %v1471_v46 }
 0x373   :  { %1588 = vmatpush.msrb.mxu3 %v1470_v47 }
 0x375   :  { %1589 = vmatpush.msrb.mxu3 %v1469_v49 }
 0x377   :  { %1590 = vmatpush.msrb.mxu3 %v1468_v52  ;;  %v1494_v52 = vld [vmem:[%s3777_s9 + $0xe8] sm:$0xff] }
 0x379   :  { %1591 = vmatpush.msrb.mxu3 %v1467_v53  ;;  %v1493_v53 = vld [vmem:[%s3777_s9 + $0xe0] sm:$0xff] }
 0x37b   :  { %1592 = vmatpush.msrb.mxu3 %v1466_v54  ;;  %v1491_v54 = vld [vmem:[%s3777_s9 + $0xd0] sm:$0xff] }
 0x37d   :  { %1593 = vmatpush.msrb.mxu3 %v1465_v19  ;;  %v1490_v19 = vld [vmem:[%s3777_s9 + $0xc8] sm:$0xff] }
 0x3c9   :  { %v1325_v7 = vpop.xlane.xlu1 %1324 }
 0x3ca   :  { %v1333_v58 = vmul.f32 %v3123_v44, %v1325_v7 }
 0x3cc   :  { %v3126_v59 = vsub.f32 %v864_v34, %v1333_v58 }
 0x3ce   :  { %v1335_v61 = vmul.f32 %v3126_v59, %v3126_v59 }
 0x3d0   :  { %v1336_v63 = vsel %vm1224_vm10, %v1335_v61, 0.0 }
 0x3d1   :  { %1337 = vadd.xlane.f32.xlu1 %v1336_v63  ;;  %v3152_v28 = vpop.xlane.xlu1 %1353 }
 0x3d2   :  { %v1355_v40 = vmul.f32 %v3152_v28, %v3123_v44 }
 0x3d4   :  { %v3233_v45 = vsub.f32 %v3115_v37, %v1355_v40  ;;  %v1495_v37 = vld [vmem:[%s3777_s9 + $0xf0] sm:$0xff] }
 0x3d5   :  { %v1543_v40 = vld [vmem:[%s3777_s9 + $0x270] sm:$0xff] }
 0x3d6   :  { %v1357_v46 = vmul.f32 %v3233_v45, %v3233_v45 }
 0x3e3   :  { %v1128_v31 = vpop.f32.mrf.mxu1 }
 0x3e4   :  { %v1129_v0 = vadd.f32 %v1128_v31, %v1105_v17 }
 0x3e6   :  { %v3139_v25 = vmul.f32 0.17677669, %v1129_v0 }
 0x3e8   :  { %v1137_v6 = vsel %vm1136_vm12, %v3139_v25, -inf }
 0x3eb   :  { %v1131_v2 = vpop.f32.mrf.mxu1 }
 0x3ec   :  { %v1132_v38 = vadd.f32 %v1131_v2, %v1108_v1 }
 0x3ee   :  { %v3141_v16 = vmul.f32 0.17677669, %v1132_v38 }
 0x3f0   :  { %v1139_v3 = vsel %vm1138_vm13, %v3141_v16, -inf }
 0x3f1   :  { %v1140_v4 = vmax.f32 %v1137_v6, %v1139_v3 }
 0x3f3   :  { %1141 = vmax.xlane.f32.xlu0 %v1140_v4 }
 0x444   :  { %v1338_v34 = vpop.xlane.xlu1 %1337 }
 0x445   :  { %v1339_v36 = vmul.f32 %v1338_v34, %v3123_v44  ;;  %v860_v34 = vmax.f32 %v3121_v56, 1e-30 }
 0x447   :  { %v1340_v21 = vadd.f32 1e-05, %v1339_v36 }
 0x449   :  { %2118 = vrsqrt.f32 %v1340_v21  ;;  %vm1347_vm15 = vweird.f32 %v1340_v21 }
 0x44f   :  { %v2119_v51 = vpop.eup %2118 }
 0x450   :  { %v1342_v14 = vmul.f32 %v2119_v51, %v1340_v21  ;;  %vm1348_vm14 = vweird.f32 %v2119_v51 }
 0x451   :  { %vm1349_vm0 = vmor %vm1347_vm15, %vm1348_vm14 }
 0x452   :  { %v1343_v55 = vmul.f32 %v2119_v51, %v1342_v14  ;;  %v1492_v14 = vld [vmem:[%s3777_s9 + $0xd8] sm:$0xff] }
 0x454   :  { %v1344_v22 = vmul.f32 0.5, %v1343_v55  ;;  %v1489_v55 = vld [vmem:[%s3777_s9 + $0xc0] sm:$0xff] }
 0x456   :  { %v1345_v61 = vsub.f32 1.5, %v1344_v22 }
 0x458   :  { %v1346_v31 = vmul.f32 %v2119_v51, %v1345_v61  ;;  %v1487_v61 = vld [vmem:[%s3777_s9 + $0xb0] sm:$0xff] }
 0x45a   :  { %v1350_v2 = vsel %vm1349_vm0, %v2119_v51, %v1346_v31  ;;  %v1358_v51 = vsel %vm1224_vm10, %v1357_v46, 0.0  ;;  %v1511_v46 = vld [vmem:[%s3777_s9 + $0x170] sm:$0xff] }
 0x45b   :  { %v1351_v38 = vmul.f32 %v1350_v2, %v3126_v59  ;;  %v935_v59 = vperm.slane %v2764_v50, 1  ;;  %v1484_v2 = vld [vmem:[%s3777_s9 + $0x98] sm:$0xff] }
 0x466   :  { %v1142_v10 = vpop.xlane.xlu0 %1141 }
 0x467   :  { %v1143_v11 = vrot.slane %v1142_v10, 4 }
 0x469   :  { %v1144_v12 = vmax.f32 %v1142_v10, %v1143_v11  ;;  %v1213_v11 = vmul.u32 5, %v2835_v23 }
 0x46b   :  { %v1145_v15 = vrot.slane %v1144_v12, 2  ;;  %vm1214_vm1 = vcmp.ge.s32.totalorder %v2862_v32, %v1213_v11 }
 0x46d   :  { %v1146_v18 = vmax.f32 %v1144_v12, %v1145_v15  ;;  %v1215_v12 = vmul.u32 5, %v2840_v27 }
 0x46f   :  { %v1147_v26 = vrot.slane %v1146_v18, 1  ;;  %vm1216_vm2 = vcmp.lt.s32.totalorder %v2862_v32, %v1215_v12 }
 0x470   :  { %vm1217_vm3 = vmand %vm1214_vm1, %vm1216_vm2  ;;  %vm1690_vm2 = vcmask 523264  }
 0x471   :  { %v1148_v13 = vmax.f32 %v1146_v18, %v1147_v26  ;;  %v1010_v26 = vadd.f32 %v3128_v60, %v935_v59  ;;  %v2075_v50 = vsel %vm1217_vm3, 1.0, %v2156_v57 }
 0x473   :  { %2093 = vpush %v1148_v13  ;;  %v936_v13 = vperm.slane %v2850_v29, 1 }
 0x475   :  { %v1036_v23 = vadd.f32 %v3137_v41, %v936_v13  ;;  %v1033_v32 = vadd.f32 %v3132_v62, %v936_v13 }
 0x4a4   :  { %s2094_s15 = spop %2093 }
 0x4a5   :  { %v1150_v7 = vstv %s2094_s15 }
 0x4a6   :  { %v1151_v58 = vsub.f32 %v3139_v25, %v1150_v7  ;;  %v1152_v17 = vsub.f32 %v3141_v16, %v1150_v7  ;;  %v1440_v25 = vperm.slane %v2745_v24, 2  ;;  %v1450_v16 = vperm.slane %v2745_v24, 3  ;;  %v1488_v7 = vld [vmem:[%s3777_s9 + $0xb8] sm:$0xff] }
 0x4a7   :  { %v1013_v24 = vadd.f32 %v3135_v48, %v935_v59 }
 0x4a8   :  { %v1153_v63 = vmul.f32 1.442695, %v1151_v58  ;;  %v1155_v0 = vmul.f32 1.442695, %v1152_v17  ;;  %v1445_v6 = vmul.f32 %v1440_v25, %v1351_v38  ;;  %v1486_v17 = vld [vmem:[%s3777_s9 + $0xa8] sm:$0xff]  ;;  %v1483_v25 = vld [vmem:[%s3777_s9 + $0x90] sm:$0xff] }
 0x4aa   :  { %2120 = vpow2.f32 %v1153_v63  ;;  %v1455_v4 = vadd.f32 %v1450_v16, %v1445_v6  ;;  %v1482_v16 = vld [vmem:[%s3777_s9 + $0x88] sm:$0xff] }
 0x4ab   :  { %2122 = vpow2.f32 %v1155_v0  ;;  %v1485_v0 = vld [vmem:[%s3777_s9 + $0xa0] sm:$0xff] }
 0x4ac   :  { %v1460_v5 = vmax.f32 %v1455_v4, 0.0  ;;  %v1481_v4 = vld [vmem:[%s3777_s9 + $0x80] sm:$0xff] }
 0x4b0   :  { %v2121_v1 = vpop.eup %2120 }
 0x4b1   :  { %2071 = vmatmul.msk.f32.vlgmr.msra.gmra.mxu2 %vm1136_vm12, %v2121_v1  ;;  %2073 = vmatmul.msk.f32.vlgmr.msra.gmra.mxu3 %vm1136_vm12, %v2121_v1  ;;  %v2123_v3 = vpop.eup %2122 }
 0x4b9   :  { %2072 = vmatmul.msk.f32.gmra.mxu2 %vm1136_vm12, %v2123_v3  ;;  %2074 = vmatmul.msk.f32.gmra.mxu3 %vm1136_vm12, %v2123_v3 }
 0x4c1   :  { %1594 = vmatmul.f32.vlgmr.msrb.gmra.mxu3 %v1460_v5 }
 0x534   :  { %v1180_v9 = vpop.f32.mrf.mxu2  ;;  %v1203_v10 = vpop.f32.mrf.mxu3 }
 0x535   :  { %v1209_v27 = vmul.f32 %v1180_v9, %v1010_v26  ;;  %v1210_v60 = vmul.f32 %v1203_v10, %v1033_v32 }
 0x53c   :  { %v1183_v15 = vpop.f32.mrf.mxu2  ;;  %v1206_v18 = vpop.f32.mrf.mxu3 }
 0x53d   :  { %v1211_v30 = vmul.f32 %v1183_v15, %v1013_v24  ;;  %2082 = vmatpush.msk.msrb.mxu0 %vm1224_vm10, %v1206_v18  ;;  %v1212_v48 = vmul.f32 %v1206_v18, %v1036_v23  ;;  %v2158_v24 = vmov 92   ;;  %v3313_v23 = vld [vmem:[%s3778_s0] sm:$0x3] }
 0x53e   :  { %2104 = vset.pattern.permute.xlu1 %v2158_v24  ;;  %2105 = vset.pattern.permute.xlu0 %v2158_v24 }
 0x53f   :  { %2076 = vmatpush.msk.msrb.mxu2 %vm1224_vm10, %v1211_v30  ;;  %1312 = vmatpush.msrb.mxu0 %v1203_v10  ;;  %v1544_v10 = vld [vmem:[%s3777_s9 + $0x278] sm:$0xff] }
 0x540   :  { %2083 = vmatmul.msk.f32.vlgmr.msrb.gmra.mxu0 %vm1220_vm5, %v2075_v50  ;;  %1658 = vmatpush.msra.mxu3 %v1544_v10  ;;  %v1522_v10 = vld [vmem:[%s3777_s9 + $0x1c8] sm:$0xff] }
 0x541   :  { %1252 = vmatpush.msrb.mxu2 %v1209_v27 }
 0x542   :  { %2077 = vmatmul.msk.f32.vlgmr.msrb.gmra.mxu2 %vm1220_vm5, %v2075_v50  ;;  %1659 = vmatpush.msra.mxu3 %v1543_v40 }
 0x543   :  { %2078 = vmatpush.msk.msra.mxu2 %vm1224_vm10, %v1212_v48 }
 0x545   :  { %1272 = vmatpush.msra.mxu2 %v1210_v60 }
 0x547   :  { %2080 = vmatpush.msk.msrb.mxu2 %vm1224_vm10, %v1183_v15 }
 0x549   :  { %1292 = vmatpush.msrb.mxu2 %v1180_v9 }
 0x54a   :  { %2079 = vmatmul.msk.f32.vlgmr.msra.gmra.mxu2 %vm1220_vm5, %v2075_v50 }
 0x552   :  { %2081 = vmatmul.msk.f32.vlgmr.msrb.gmra.mxu2 %vm1220_vm5, %v2075_v50 }
 0x5bd   :  { %v1314_v29 = vpop.f32.mrf.mxu0 }
 0x5be   :  { %v1318_v41 = vmax.f32 %v1314_v29, 1e-30 }
 0x5c0   :  { %2124 = vrcp.f32 %v1318_v41  ;;  %v3320_v41 = vld [vmem:[%s3771_s12 + $0x8] sm:$0xff] }
 0x5c1   :  { %2126 = vrcp.f32 %v860_v34 }
 0x5c5   :  { %v1254_v20 = vpop.f32.mrf.mxu2 }
 0x5c6   :  { %v2125_v35 = vpop.eup %2124 }
 0x5c7   :  { %v2127_v39 = vpop.eup %2126 }
 0x5c8   :  { %v866_v42 = vmul.f32 %v2127_v39, %v3103_v8  ;;  %v1496_v8 = vld [vmem:[%s3777_s9 + $0xf8] sm:$0xff] }
 0x5c9   :  { %1598 = vmatpush.msra.mxu2 %v1496_v8  ;;  %v1546_v8 = vld [vmem:[%s3777_s9 + $0x288] sm:$0xff] }
 0x5ca   :  { %v1374_v56 = vsel %vm1224_vm10, %v866_v42, 0.0 }
 0x5cb   :  { %1599 = vmatpush.msra.mxu2 %v1495_v37  ;;  %v1509_v37 = vld [vmem:[%s3777_s9 + $0x160] sm:$0xff] }
 0x5cd   :  { %v1274_v62 = vpop.f32.mrf.mxu2  ;;  %1600 = vmatpush.msra.mxu2 %v1494_v52  ;;  %v1537_v52 = vld [vmem:[%s3777_s9 + $0x240] sm:$0xff] }
 0x5ce   :  { %v1322_v33 = vmul.f32 %v2125_v35, %v1274_v62  ;;  %v1451_v62 = vperm.slane %v3320_v41, 3 }
 0x5cf   :  { %1601 = vmatpush.msra.mxu2 %v1493_v53  ;;  %v1545_v53 = vld [vmem:[%s3777_s9 + $0x280] sm:$0xff] }
 0x5d0   :  { %v1418_v36 = vsel %vm1224_vm10, %v1322_v33, 0.0 }
 0x5d1   :  { %1419 = vadd.xlane.f32.xlu2 %v1418_v36  ;;  %1602 = vmatpush.msra.mxu2 %v1492_v14  ;;  %v1508_v14 = vld [vmem:[%s3777_s9 + $0x158] sm:$0xff] }
 0x5d3   :  { %1603 = vmatpush.msra.mxu2 %v1491_v54  ;;  %v1536_v54 = vld [vmem:[%s3777_s9 + $0x238] sm:$0xff] }
 0x5d5   :  { %v1294_v43 = vpop.f32.mrf.mxu2  ;;  %1604 = vmatpush.msra.mxu2 %v1490_v19  ;;  %v1528_v19 = vld [vmem:[%s3777_s9 + $0x1f8] sm:$0xff] }
 0x5d6   :  { %v1317_v21 = vmax.f32 %v1294_v43, 1e-30  ;;  %v1541_v43 = vld [vmem:[%s3777_s9 + $0x260] sm:$0xff] }
 0x5d7   :  { %1605 = vmatpush.msra.mxu2 %v1489_v55  ;;  %v1507_v55 = vld [vmem:[%s3777_s9 + $0x150] sm:$0xff] }
 0x5d8   :  { %2128 = vrcp.f32 %v1317_v21  ;;  %v1512_v21 = vld [vmem:[%s3777_s9 + $0x178] sm:$0xff] }
 0x5d9   :  { %1375 = vadd.xlane.f32.xlu2 %v1374_v56  ;;  %1606 = vmatpush.msra.mxu2 %v1488_v7  ;;  %v1548_v56 = vld [vmem:[%s3777_s9 + $0x298] sm:$0xf]  ;;  %v1527_v7 = vld [vmem:[%s3777_s9 + $0x1f0] sm:$0xff] }
 0x5da   :  { %1618 = vmatpush.msra.mxu0 %v1512_v21  ;;  %2084 = vmatpush.msk.msrb.mxu1 %vm607_vm4, %v1548_v56  ;;  %vm1552_vm4 = vcmask 228352  }
 0x5db   :  { %1607 = vmatpush.msra.mxu2 %v1487_v61  ;;  %v1534_v61 = vld [vmem:[%s3777_s9 + $0x228] sm:$0xff] }
 0x5dc   :  { %1619 = vmatpush.msra.mxu0 %v1511_v46 }
 0x5dd   :  { %1608 = vmatpush.msra.mxu2 %v1486_v17  ;;  %v1526_v17 = vld [vmem:[%s3777_s9 + $0x1e8] sm:$0xff] }
 0x5de   :  { %v2129_v47 = vpop.eup %2128 }
 0x5df   :  { %v1321_v49 = vmul.f32 %v2129_v47, %v1254_v20  ;;  %1609 = vmatpush.msra.mxu2 %v1485_v0  ;;  %v1441_v20 = vperm.slane %v3320_v41, 2  ;;  %v1539_v47 = vld [vmem:[%s3777_s9 + $0x250] sm:$0xff]  ;;  %v1533_v0 = vld [vmem:[%s3777_s9 + $0x220] sm:$0xff] }
 0x5e1   :  { %1359 = vadd.xlane.f32.xlu2 %v1358_v51  ;;  %v1396_v28 = vsel %vm1224_vm10, %v1321_v49, 0.0  ;;  %1610 = vmatpush.msra.mxu2 %v1484_v2  ;;  %v1510_v51 = vld [vmem:[%s3777_s9 + $0x168] sm:$0xff]  ;;  %v1504_v2 = vld [vmem:[%s3777_s9 + $0x138] sm:$0xff] }
 0x5e2   :  { %1397 = vadd.xlane.f32.xlu0 %v1396_v28  ;;  %v1538_v28 = vld [vmem:[%s3777_s9 + $0x248] sm:$0xff]  ;;  %1620 = vmatpush.msra.mxu0 %v1510_v51 }
 0x5e3   :  { %1611 = vmatpush.msra.mxu2 %v1483_v25  ;;  %v1524_v25 = vld [vmem:[%s3777_s9 + $0x1d8] sm:$0xff] }
 0x5e4   :  { %1621 = vmatpush.msra.mxu0 %v1509_v37  ;;  %v3486_v37 = vld [vmem:[%s3771_s12 + $0x20] sm:$0xff] }
 0x5e5   :  { %1612 = vmatpush.msra.mxu2 %v1482_v16  ;;  %v1531_v16 = vld [vmem:[%s3777_s9 + $0x210] sm:$0xff] }
 0x5e6   :  { %1622 = vmatpush.msra.mxu0 %v1508_v14 }
 0x5e7   :  { %1613 = vmatpush.msra.mxu2 %v1481_v4  ;;  %v1523_v4 = vld [vmem:[%s3777_s9 + $0x1d0] sm:$0xff] }
 0x5e8   :  { %1623 = vmatpush.msra.mxu0 %v1507_v55 }
 0x644   :  { %v1420_v22 = vpop.xlane.xlu2 %1419 }
 0x645   :  { %v1421_v58 = vmul.f32 %v1420_v22, %v3123_v44  ;;  %v1535_v22 = vld [vmem:[%s3777_s9 + $0x230] sm:$0xff] }
 0x647   :  { %v3271_v63 = vsub.f32 %v1322_v33, %v1421_v58  ;;  %v1506_v58 = vld [vmem:[%s3777_s9 + $0x148] sm:$0xff] }
 0x648   :  { %1624 = vmatpush.msra.mxu0 %v1506_v58 }
 0x649   :  { %v1423_v31 = vmul.f32 %v3271_v63, %v3271_v63 }
 0x64b   :  { %v1424_v1 = vsel %vm1224_vm10, %v1423_v31, 0.0  ;;  %v1505_v31 = vld [vmem:[%s3777_s9 + $0x140] sm:$0xff] }
 0x64c   :  { %v1376_v38 = vpop.xlane.xlu2 %1375  ;;  %1425 = vadd.xlane.f32.xlu0 %v1424_v1  ;;  %1625 = vmatpush.msra.mxu0 %v1505_v31  ;;  %v1525_v1 = vld [vmem:[%s3777_s9 + $0x1e0] sm:$0xff] }
 0x64d   :  { %v1377_v6 = vmul.f32 %v1376_v38, %v3123_v44  ;;  %v1532_v38 = vld [vmem:[%s3777_s9 + $0x218] sm:$0xff] }
 0x64e   :  { %1626 = vmatpush.msra.mxu0 %v1504_v2 }
 0x64f   :  { %v3292_v3 = vsub.f32 %v866_v42, %v1377_v6  ;;  %v1542_v42 = vld [vmem:[%s3777_s9 + $0x268] sm:$0xff]  ;;  %v1503_v6 = vld [vmem:[%s3777_s9 + $0x130] sm:$0xff] }
 0x650   :  { %1660 = vmatpush.msra.mxu3 %v1542_v42  ;;  %1627 = vmatpush.msra.mxu0 %v1503_v6  ;;  %v1513_v42 = vld [vmem:[%s3777_s9 + $0x180] sm:$0xff] }
 0x651   :  { %v1379_v5 = vmul.f32 %v3292_v3, %v3292_v3 }
 0x652   :  { %1661 = vmatpush.msra.mxu3 %v1541_v43 }
 0x653   :  { %v1380_v9 = vsel %vm1224_vm10, %v1379_v5, 0.0  ;;  %v1502_v5 = vld [vmem:[%s3777_s9 + $0x128] sm:$0xff] }
 0x654   :  { %1381 = vadd.xlane.f32.xlu1 %v1380_v9  ;;  %v1360_v11 = vpop.xlane.xlu2 %1359  ;;  %v1530_v9 = vld [vmem:[%s3777_s9 + $0x208] sm:$0xff]  ;;  %1628 = vmatpush.msra.mxu0 %v1502_v5 }
 0x655   :  { %v1361_v12 = vmul.f32 %v1360_v11, %v3123_v44  ;;  %v1398_v59 = vpop.xlane.xlu0 %1397  ;;  %v1501_v11 = vld [vmem:[%s3777_s9 + $0x120] sm:$0xff] }
 0x656   :  { %v1399_v15 = vmul.f32 %v1398_v59, %v3123_v44  ;;  %1629 = vmatpush.msra.mxu0 %v1501_v11  ;;  %v1521_v59 = vld [vmem:[%s3777_s9 + $0x1c0] sm:$0xff] }
 0x657   :  { %v1362_v18 = vadd.f32 1e-05, %v1361_v12  ;;  %v1529_v12 = vld [vmem:[%s3777_s9 + $0x200] sm:$0xff] }
 0x658   :  { %v3305_v26 = vsub.f32 %v1321_v49, %v1399_v15  ;;  %v1547_v49 = vld [vmem:[%s3777_s9 + $0x290] sm:$0xff]  ;;  %v1500_v15 = vld [vmem:[%s3777_s9 + $0x118] sm:$0xff] }
 0x659   :  { %2130 = vrsqrt.f32 %v1362_v18  ;;  %vm1369_vm7 = vweird.f32 %v1362_v18  ;;  %1571 = vmatpush.msrb.mxu1 %v1547_v49  ;;  %1630 = vmatpush.msra.mxu0 %v1500_v15 }
 0x65a   :  { %v1401_v13 = vmul.f32 %v3305_v26, %v3305_v26 }
 0x65b   :  { %1572 = vmatpush.msrb.mxu1 %v1546_v8 }
 0x65c   :  { %v1402_v30 = vsel %vm1224_vm10, %v1401_v13, 0.0  ;;  %v1520_v13 = vld [vmem:[%s3777_s9 + $0x1b8] sm:$0xff] }
 0x65d   :  { %1403 = vadd.xlane.f32.xlu2 %v1402_v30  ;;  %1573 = vmatpush.msrb.mxu1 %v1545_v53  ;;  %v1499_v30 = vld [vmem:[%s3777_s9 + $0x110] sm:$0xff] }
 0x65e   :  { %1631 = vmatpush.msra.mxu0 %v1499_v30 }
 0x65f   :  { %v2131_v27 = vpop.eup %2130  ;;  %1638 = vmatpush.msra.mxu1 %v1528_v19 }
 0x660   :  { %v1364_v50 = vmul.f32 %v2131_v27, %v1362_v18  ;;  %1550 = vrot.lane.b32.xlu0 %v3313_v23, %s2159_s6  ;;  %vm1370_vm6 = vweird.f32 %v2131_v27 }
 0x661   :  { %vm1371_vm8 = vmor %vm1369_vm7, %vm1370_vm6  ;;  %1639 = vmatpush.msra.mxu1 %v1527_v7 }
 0x662   :  { %v1365_v32 = vmul.f32 %v2131_v27, %v1364_v50  ;;  %v1519_v50 = vld [vmem:[%s3777_s9 + $0x1b0] sm:$0xff] }
 0x663   :  { %1640 = vmatpush.msra.mxu1 %v1526_v17 }
 0x664   :  { %v1366_v48 = vmul.f32 0.5, %v1365_v32  ;;  %v1498_v32 = vld [vmem:[%s3777_s9 + $0x108] sm:$0xff] }
 0x665   :  { %1641 = vmatpush.msra.mxu1 %v1525_v1  ;;  %1632 = vmatpush.msra.mxu0 %v1498_v32  ;;  %v1720_v32 = vld [vmem:[%s3779_s10 + $0xe0] sm:$0xff] }
 0x666   :  { %v1367_v60 = vsub.f32 1.5, %v1366_v48  ;;  %v1518_v48 = vld [vmem:[%s3777_s9 + $0x1a8] sm:$0xff] }
 0x667   :  { %1642 = vmatpush.msra.mxu1 %v1524_v25 }
 0x668   :  { %v1368_v29 = vmul.f32 %v2131_v27, %v1367_v60  ;;  %v1497_v60 = vld [vmem:[%s3777_s9 + $0x100] sm:$0xff] }
 0x669   :  { %1643 = vmatpush.msra.mxu1 %v1523_v4  ;;  %1633 = vmatpush.msra.mxu0 %v1497_v60  ;;  %v1719_v60 = vld [vmem:[%s3779_s10 + $0xd8] sm:$0xff] }
 0x66a   :  { %v1372_v34 = vsel %vm1371_vm8, %v2131_v27, %v1368_v29  ;;  %v1517_v29 = vld [vmem:[%s3777_s9 + $0x1a0] sm:$0xff] }
 0x66b   :  { %v1373_v35 = vmul.f32 %v1372_v34, %v3233_v45  ;;  %v1540_v45 = vld [vmem:[%s3777_s9 + $0x258] sm:$0xff]  ;;  %1644 = vmatpush.msra.mxu1 %v1522_v10 }
 0x66c   :  { %1662 = vmatpush.msra.mxu3 %v1540_v45  ;;  %v1516_v34 = vld [vmem:[%s3777_s9 + $0x198] sm:$0xff] }
 0x66d   :  { %v1446_v33 = vmul.f32 %v1441_v20, %v1373_v35  ;;  %1682 = vperm.xlu1 %2104, %v3313_v23   ;;  %1645 = vmatpush.msra.mxu1 %v1521_v59 }
 0x66e   :  { %1663 = vmatpush.msra.mxu3 %v1539_v47 }
 0x66f   :  { %v1456_v36 = vadd.f32 %v1451_v62, %v1446_v33  ;;  %1646 = vmatpush.msra.mxu1 %v1520_v13  ;;  %v1515_v62 = vld [vmem:[%s3777_s9 + $0x190] sm:$0xff] }
 0x670   :  { %1664 = vmatpush.msra.mxu3 %v1538_v28 }
 0x671   :  { %v1461_v39 = vmax.f32 %v1456_v36, 0.0  ;;  %1647 = vmatpush.msra.mxu1 %v1519_v50  ;;  %v1723_v50 = vld [vmem:[%s3779_s10 + $0xf8] sm:$0xff] }
 0x672   :  { %1665 = vmatpush.msra.mxu3 %v1537_v52  ;;  %v1444_v52 = vperm.slane %v3486_v37, 2  ;;  %1759 = vmatpush.msrb.mxu0 %v1723_v50 }
 0x673   :  { %1614 = vmatmul.f32.vlgmr.msra.gmra.mxu2 %v1461_v39  ;;  %1648 = vmatpush.msra.mxu1 %v1518_v48  ;;  %v1514_v39 = vld [vmem:[%s3777_s9 + $0x188] sm:$0xff]  ;;  %v1718_v48 = vld [vmem:[%s3779_s10 + $0xd0] sm:$0xff] }
 0x674   :  { %1666 = vmatpush.msra.mxu3 %v1536_v54  ;;  %v1454_v54 = vperm.slane %v3486_v37, 3 }
 0x675   :  { %1649 = vmatpush.msra.mxu1 %v1517_v29  ;;  %v1716_v29 = vld [vmem:[%s3779_s10 + $0xc0] sm:$0xff] }
 0x676   :  { %1667 = vmatpush.msra.mxu3 %v1535_v22 }
 0x677   :  { %1650 = vmatpush.msra.mxu1 %v1516_v34  ;;  %v1714_v34 = vld [vmem:[%s3779_s10 + $0xb0] sm:$0xff] }
 0x678   :  { %1668 = vmatpush.msra.mxu3 %v1534_v61 }
 0x679   :  { %1651 = vmatpush.msra.mxu1 %v1515_v62  ;;  %v1712_v62 = vld [vmem:[%s3779_s10 + $0xa0] sm:$0xff] }
 0x67a   :  { %1669 = vmatpush.msra.mxu3 %v1533_v0  ;;  %v3494_v0 = vld [vmem:[%s3771_s12 + $0x10] sm:$0xff] }
 0x67b   :  { %1652 = vmatpush.msra.mxu1 %v1514_v39  ;;  %v1452_v25 = vperm.slane %v3494_v0, 3  ;;  %v1711_v39 = vld [vmem:[%s3779_s10 + $0x98] sm:$0xff] }
 0x67c   :  { %1670 = vmatpush.msra.mxu3 %v1532_v38 }
 0x67d   :  { %1653 = vmatpush.msra.mxu1 %v1513_v42  ;;  %v1709_v42 = vld [vmem:[%s3779_s10 + $0x88] sm:$0xff] }
 0x67e   :  { %1671 = vmatpush.msra.mxu3 %v1531_v16 }
 0x680   :  { %1672 = vmatpush.msra.mxu3 %v1530_v9 }
 0x682   :  { %1673 = vmatpush.msra.mxu3 %v1529_v12 }
 0x6bf   :  { %v1426_v24 = vpop.xlane.xlu0 %1425 }
 0x6c0   :  { %v1427_v18 = vmul.f32 %v1426_v24, %v3123_v44 }
 0x6c2   :  { %v1428_v27 = vadd.f32 1e-05, %v1427_v18 }
 0x6c4   :  { %2132 = vrsqrt.f32 %v1428_v27  ;;  %vm1435_vm10 = vweird.f32 %v1428_v27 }
 0x6c7   :  { %v1382_v20 = vpop.xlane.xlu1 %1381 }
 0x6c8   :  { %v1383_v35 = vmul.f32 %v1382_v20, %v3123_v44  ;;  %v1717_v20 = vld [vmem:[%s3779_s10 + $0xc8] sm:$0xff] }
 0x6ca   :  { %v2133_v33 = vpop.eup %2132  ;;  %v1384_v36 = vadd.f32 1e-05, %v1383_v35  ;;  %v1715_v35 = vld [vmem:[%s3779_s10 + $0xb8] sm:$0xff] }
 0x6cb   :  { %v1430_v40 = vmul.f32 %v2133_v33, %v1428_v27  ;;  %vm1436_vm9 = vweird.f32 %v2133_v33  ;;  %v1722_v27 = vld [vmem:[%s3779_s10 + $0xf0] sm:$0xff] }
 0x6cc   :  { %2134 = vrsqrt.f32 %v1384_v36  ;;  %vm1437_vm11 = vmor %vm1435_vm10, %vm1436_vm9  ;;  %vm1391_vm13 = vweird.f32 %v1384_v36  ;;  %1739 = vmatpush.msrb.mxu2 %v1722_v27  ;;  %vm1987_vm9 = vcmask 547840   ;;  %vm1989_vm10 = vcmask 556032  }
 0x6cd   :  { %v1431_v43 = vmul.f32 %v2133_v33, %v1430_v40  ;;  %v1708_v40 = vld [vmem:[%s3779_s10 + $0x80] sm:$0xff] }
 0x6ce   :  { %1740 = vmatpush.msrb.mxu2 %v1720_v32 }
 0x6cf   :  { %v1432_v21 = vmul.f32 0.5, %v1431_v43  ;;  %v1706_v43 = vld [vmem:[%s3779_s10 + $0x70] sm:$0xff] }
 0x6d0   :  { %v1404_v45 = vpop.xlane.xlu2 %1403  ;;  %1741 = vmatpush.msrb.mxu2 %v1718_v48 }
 0x6d1   :  { %v1433_v56 = vsub.f32 1.5, %v1432_v21  ;;  %v1405_v46 = vmul.f32 %v1404_v45, %v3123_v44  ;;  %v1707_v21 = vld [vmem:[%s3779_s10 + $0x78] sm:$0xff]  ;;  %v1704_v45 = vld [vmem:[%s3779_s10 + $0x60] sm:$0xff] }
 0x6d2   :  { %v2135_v47 = vpop.eup %2134  ;;  %v1551_v49 = vpop.permute.xlu0 %1550  ;;  %1742 = vmatpush.msrb.mxu2 %v1716_v29 }
 0x6d3   :  { %v1434_v51 = vmul.f32 %v2133_v33, %v1433_v56  ;;  %v1386_v28 = vmul.f32 %v2135_v47, %v1384_v36  ;;  %v1406_v8 = vadd.f32 1e-05, %v1405_v46  ;;  %2085 = vmatmul.msk.f32.vlgmr.msrb.gmra.mxu1 %vm1552_vm4, %v1551_v49  ;;  %vm1392_vm12 = vweird.f32 %v2135_v47  ;;  %v1710_v36 = vld [vmem:[%s3779_s10 + $0x90] sm:$0xff]  ;;  %v1705_v56 = vld [vmem:[%s3779_s10 + $0x68] sm:$0xff]  ;;  %v1700_v49 = vld [vmem:[%s3779_s10 + $0x40] sm:$0xff] }
 0x6d4   :  { %vm1393_vm14 = vmor %vm1391_vm13, %vm1392_vm12  ;;  %1743 = vmatpush.msrb.mxu2 %v1714_v34  ;;  %v1702_v46 = vld [vmem:[%s3779_s10 + $0x50] sm:$0xff]  ;;  %vm1985_vm4 = vcmask 531456  }
 0x6d5   :  { %v1438_v53 = vsel %vm1437_vm11, %v2133_v33, %v1434_v51  ;;  %v1387_v14 = vmul.f32 %v2135_v47, %v1386_v28  ;;  %2136 = vrsqrt.f32 %v1406_v8  ;;  %vm1413_vm0 = vweird.f32 %v1406_v8  ;;  %v1713_v33 = vld [vmem:[%s3779_s10 + $0xa8] sm:$0xff]  ;;  %v2154_v28 = vld [vmem:[%s3771_s12] sm:$0xff] }
 0x6d6   :  { %v1439_v44 = vmul.f32 %v1438_v53, %v3271_v63  ;;  %v1442_v63 = vperm.slane %v3494_v0, 2  ;;  %1744 = vmatpush.msrb.mxu2 %v1712_v62  ;;  %v1701_v51 = vld [vmem:[%s3779_s10 + $0x48] sm:$0xff]  ;;  %v1699_v53 = vld [vmem:[%s3779_s10 + $0x38] sm:$0xff]  ;;  %vm1991_vm11 = vcmask 564224  }
 0x6d7   :  { %v1388_v19 = vmul.f32 0.5, %v1387_v14  ;;  %v1696_v14 = vld [vmem:[%s3779_s10 + $0x20] sm:$0xff] }
 0x6d8   :  { %v1449_v55 = vmul.f32 %v1444_v52, %v1439_v44  ;;  %1745 = vmatpush.msrb.mxu2 %v1710_v36  ;;  %v1698_v52 = vld [vmem:[%s3779_s10 + $0x30] sm:$0xff]  ;;  %v1697_v44 = vld [vmem:[%s3779_s10 + $0x28] sm:$0xff] }
 0x6d9   :  { %v1389_v22 = vsub.f32 1.5, %v1388_v19  ;;  %v1695_v19 = vld [vmem:[%s3779_s10 + $0x18] sm:$0xff] }
 0x6da   :  { %v1459_v7 = vadd.f32 %v1454_v54, %v1449_v55  ;;  %1746 = vmatpush.msrb.mxu2 %v1708_v40  ;;  %v1694_v54 = vld [vmem:[%s3779_s10 + $0x10] sm:$0xff]  ;;  %v1692_v55 = vld [vmem:[%s3779_s10] sm:$0xff] }
 0x6db   :  { %v2137_v58 = vpop.eup %2136  ;;  %v1390_v61 = vmul.f32 %v2135_v47, %v1389_v22  ;;  %v1693_v22 = vld [vmem:[%s3779_s10 + $0x8] sm:$0xff] }
 0x6dc   :  { %v1408_v17 = vmul.f32 %v2137_v58, %v1406_v8  ;;  %v1464_v31 = vmax.f32 %v1459_v7, 0.0  ;;  %vm1414_vm15 = vweird.f32 %v2137_v58  ;;  %1747 = vmatpush.msrb.mxu2 %v1706_v43  ;;  %v1678_v8 = vperm.slane %v2154_v28, 4  ;;  %v1820_v43 = vld [vmem:[%s3780_s11 + $0x38] sm:$0xff] }
 0x6dd   :  { %v1394_v1 = vsel %vm1393_vm14, %v2135_v47, %v1390_v61  ;;  %vm1415_vm1 = vmor %vm1413_vm0, %vm1414_vm15  ;;  %v1703_v47 = vld [vmem:[%s3779_s10 + $0x58] sm:$0xff]  ;;  %v1724_v7 = vperm.slane %v3320_v41, 4  ;;  %1872 = vmatpush.msrb.mxu1 %v1820_v43 }
 0x6de   :  { %v1395_v2 = vmul.f32 %v1394_v1, %v3292_v3  ;;  %v1409_v38 = vmul.f32 %v2137_v58, %v1408_v17  ;;  %1674 = vmatmul.f32.vlgmr.msra.gmra.mxu3 %v1464_v31  ;;  %v3504_v3 = vld [vmem:[%s3771_s12 + $0x18] sm:$0xff]  ;;  %1748 = vmatpush.msrb.mxu2 %v1704_v45  ;;  %v1595_v17 = vpop.f32.mrf.mxu3  ;;  %v1818_v45 = vld [vmem:[%s3780_s11 + $0x28] sm:$0xff] }
 0x6df   :  { %v1683_v6 = vpop.permute.xlu1 %1682  ;;  %v1443_v59 = vperm.slane %v3504_v3, 2  ;;  %v1453_v15 = vperm.slane %v3504_v3, 3  ;;  %1729 = vrot.lane.b32.xlu1 %v1678_v8, %s2159_s6  ;;  %1731 = vrot.lane.b32.xlu0 %v1724_v7, %s2159_s6  ;;  %v1831_v7 = vld [vmem:[%s3780_s11 + $0x90] sm:$0xff] }
 0x6e0   :  { %v1410_v16 = vmul.f32 0.5, %v1409_v38  ;;  %v1447_v4 = vmul.f32 %v1442_v63, %v1395_v2  ;;  %v1685_v5 = vmul.f32 %v1683_v6, %v3313_v23  ;;  %1749 = vmatpush.msrb.mxu2 %v1702_v46  ;;  %v1816_v46 = vld [vmem:[%s3780_s11 + $0x18] sm:$0xff] }
 0x6e2   :  { %v1411_v9 = vsub.f32 1.5, %v1410_v16  ;;  %v1457_v10 = vadd.f32 %v1452_v25, %v1447_v4  ;;  %1687 = vrot.lane.b32.xlu2 %v1685_v5, %s2159_s6  ;;  %1750 = vmatpush.msrb.mxu2 %v1700_v49  ;;  %v1814_v49 = vld [vmem:[%s3780_s11 + $0x8] sm:$0xff] }
 0x6e4   :  { %v1412_v11 = vmul.f32 %v2137_v58, %v1411_v9  ;;  %v1462_v12 = vmax.f32 %v1457_v10, 0.0  ;;  %1751 = vmatpush.msrb.mxu2 %v1698_v52 }
 0x6e6   :  { %v1416_v24 = vsel %vm1415_vm1, %v2137_v58, %v1412_v11  ;;  %1634 = vmatmul.f32.vlgmr.msra.gmra.mxu0 %v1462_v12  ;;  %1752 = vmatpush.msrb.mxu2 %v1696_v14  ;;  %v1725_v58 = vperm.slane %v3494_v0, 4 }
 0x6e7   :  { %v1417_v23 = vmul.f32 %v1416_v24, %v3305_v26  ;;  %v1721_v26 = vld [vmem:[%s3779_s10 + $0xe8] sm:$0xff]  ;;  %s2160_s10 = smov 127  }
 0x6e8   :  { %1760 = vmatpush.msrb.mxu0 %v1721_v26  ;;  %1753 = vmatpush.msrb.mxu2 %v1694_v54  ;;  %v1836_v54 = vld [vmem:[%s3780_s11 + $0xb8] sm:$0xff] }
 0x6e9   :  { %v1448_v18 = vmul.f32 %v1443_v59, %v1417_v23  ;;  %v1853_v23 = vperm.slane %v3504_v3, 4 }
 0x6ea   :  { %1761 = vmatpush.msrb.mxu0 %v1719_v60  ;;  %1754 = vmatpush.msrb.mxu2 %v1692_v55  ;;  %v1834_v55 = vld [vmem:[%s3780_s11 + $0xa8] sm:$0xff] }
 0x6eb   :  { %v1458_v13 = vadd.f32 %v1453_v15, %v1448_v18  ;;  %1733 = vrot.lane.b32.xlu2 %v1725_v58, %s2159_s6  ;;  %v1830_v58 = vld [vmem:[%s3780_s11 + $0x88] sm:$0xff] }
 0x6ec   :  { %1762 = vmatpush.msrb.mxu0 %v1717_v20 }
 0x6ed   :  { %v1463_v30 = vmax.f32 %v1458_v13, 0.0 }
 0x6ee   :  { %1763 = vmatpush.msrb.mxu0 %v1715_v35 }
 0x6ef   :  { %1654 = vmatmul.f32.vlgmr.msra.gmra.mxu1 %v1463_v30 }
 0x6f0   :  { %1764 = vmatpush.msrb.mxu0 %v1713_v33 }
 0x6f2   :  { %1765 = vmatpush.msrb.mxu0 %v1711_v39 }
 0x6f4   :  { %1766 = vmatpush.msrb.mxu0 %v1709_v42 }
 0x6f6   :  { %1767 = vmatpush.msrb.mxu0 %v1707_v21  ;;  %v1615_v63 = vpop.f32.mrf.mxu2  ;;  %v1819_v21 = vld [vmem:[%s3780_s11 + $0x30] sm:$0xff] }
 0x6f7   :  { %1873 = vmatpush.msrb.mxu1 %v1819_v21 }
 0x6f8   :  { %1768 = vmatpush.msrb.mxu0 %v1705_v56  ;;  %v1817_v56 = vld [vmem:[%s3780_s11 + $0x20] sm:$0xff] }
 0x6f9   :  { %1874 = vmatpush.msrb.mxu1 %v1818_v45 }
 0x6fa   :  { %1769 = vmatpush.msrb.mxu0 %v1703_v47  ;;  %v1815_v47 = vld [vmem:[%s3780_s11 + $0x10] sm:$0xff] }
 0x6fb   :  { %1875 = vmatpush.msrb.mxu1 %v1817_v56 }
 0x6fc   :  { %1770 = vmatpush.msrb.mxu0 %v1701_v51  ;;  %v1813_v51 = vld [vmem:[%s3780_s11] sm:$0xff] }
 0x6fd   :  { %1876 = vmatpush.msrb.mxu1 %v1816_v46 }
 0x6fe   :  { %1771 = vmatpush.msrb.mxu0 %v1699_v53 }
 0x6ff   :  { %1877 = vmatpush.msrb.mxu1 %v1815_v47 }
 0x700   :  { %1772 = vmatpush.msrb.mxu0 %v1697_v44  ;;  %v1885_v44 = vperm.slane %v3486_v37, 4  ;;  %v1833_v37 = vld [vmem:[%s3780_s11 + $0xa0] sm:$0xff] }
 0x701   :  { %1878 = vmatpush.msrb.mxu1 %v1814_v49 }
 0x702   :  { %1773 = vmatpush.msrb.mxu0 %v1695_v19  ;;  %v1835_v19 = vld [vmem:[%s3780_s11 + $0xb0] sm:$0xff] }
 0x703   :  { %1879 = vmatpush.msrb.mxu1 %v1813_v51 }
 0x704   :  { %1774 = vmatpush.msrb.mxu0 %v1693_v22  ;;  %v1832_v22 = vld [vmem:[%s3780_s11 + $0x98] sm:$0xff] }
 0x705   :  { %1891 = vmatpush.msra.mxu1 %v1836_v54 }
 0x707   :  { %1892 = vmatpush.msra.mxu1 %v1835_v19 }
 0x709   :  { %1893 = vmatpush.msra.mxu1 %v1834_v55 }
 0x70b   :  { %1894 = vmatpush.msra.mxu1 %v1833_v37 }
 0x70d   :  { %1895 = vmatpush.msra.mxu1 %v1832_v22 }
 0x70f   :  { %1896 = vmatpush.msra.mxu1 %v1831_v7 }
 0x711   :  { %1897 = vmatpush.msra.mxu1 %v1830_v58 }
 0x73c   :  { %v1688_v41 = vpop.permute.xlu2 %1687 }
 0x745   :  { %v3614_v10 = vpop.permute.xlu2 %1733 }
 0x750   :  { %v1575_v61 = vpop.f32.mrf.mxu1 }
 0x751   :  { %v1596_v31 = vadd.f32 %v1595_v17, %v1575_v61  ;;  %v1732_v11 = vpop.permute.xlu0 %1731  ;;  %v1730_v15 = vpop.permute.xlu1 %1729  ;;  %v1829_v61 = vld [vmem:[%s3780_s11 + $0x80] sm:$0xff]  ;;  %v1828_v17 = vld [vmem:[%s3780_s11 + $0x78] sm:$0xff] }
 0x752   :  { %v1736_v12 = vsel %vm1690_vm2, %v1732_v11, %v3614_v10  ;;  %v1735_v13 = vsel %vm1690_vm2, %v1730_v15, %v1732_v11  ;;  %1898 = vmatpush.msra.mxu1 %v1829_v61  ;;  %v1849_v11 = vld [vmem:[%s3780_s11 + $0x120] sm:$0xff]  ;;  %v1844_v15 = vld [vmem:[%s3780_s11 + $0xf8] sm:$0xff] }
 0x753   :  { %v1616_v2 = vadd.f32 %v1615_v63, %v1596_v31  ;;  %v1827_v31 = vld [vmem:[%s3780_s11 + $0x70] sm:$0xff]  ;;  %v1826_v63 = vld [vmem:[%s3780_s11 + $0x68] sm:$0xff] }
 0x754   :  { %1899 = vmatpush.msra.mxu1 %v1828_v17 }
 0x756   :  { %1900 = vmatpush.msra.mxu1 %v1827_v31 }
 0x758   :  { %1901 = vmatpush.msra.mxu1 %v1826_v63 }
 0x761   :  { %v1675_v16 = vpop.f32.mrf.mxu3 }
 0x763   :  { %v1635_v1 = vpop.f32.mrf.mxu0 }
 0x764   :  { %v1636_v38 = vadd.f32 %v1635_v1, %v1616_v2  ;;  %v1825_v1 = vld [vmem:[%s3780_s11 + $0x60] sm:$0xff]  ;;  %v1824_v2 = vld [vmem:[%s3780_s11 + $0x58] sm:$0xff] }
 0x765   :  { %1902 = vmatpush.msra.mxu1 %v1825_v1 }
 0x767   :  { %1903 = vmatpush.msra.mxu1 %v1824_v2 }
 0x76c   :  { %v1655_v25 = vpop.f32.mrf.mxu1 }
 0x76d   :  { %v1656_v6 = vadd.f32 %v1655_v25, %v1636_v38  ;;  %v1823_v25 = vld [vmem:[%s3780_s11 + $0x50] sm:$0xff] }
 0x76e   :  { %1904 = vmatpush.msra.mxu1 %v1823_v25 }
 0x76f   :  { %v1676_v4 = vadd.f32 %v1675_v16, %v1656_v6  ;;  %v1822_v6 = vld [vmem:[%s3780_s11 + $0x48] sm:$0xff]  ;;  %v1821_v16 = vld [vmem:[%s3780_s11 + $0x40] sm:$0xff] }
 0x770   :  { %1905 = vmatpush.msra.mxu1 %v1822_v6 }
 0x771   :  { %v1679_v5 = vadd.f32 %v1678_v8, %v1676_v4  ;;  %v3705_v4 = vld [vmem:[%s3771_s12 + $0x28] sm:$0xff]  ;;  %s2163_s12 = smov 67  }
 0x772   :  { %1906 = vmatpush.msra.mxu1 %v1821_v16 }
 0x773   :  { %v1680_v9 = vmax.f32 %v1679_v5, 0.0  ;;  %v1912_v5 = vperm.slane %v3705_v4, 4 }
 0x775   :  { %v1691_v0 = vsel %vm1690_vm2, %v1680_v9, %v1688_v41  ;;  %v1851_v9 = vld [vmem:[%s3780_s11 + $0x130] sm:$0xff] }
 0x776   :  { %1755 = vmatmul.f32.vlgmr.msrb.gmra.mxu2 %v1691_v0  ;;  %1775 = vmatmul.f32.vlgmr.msrb.gmra.mxu0 %v1691_v0  ;;  %v1850_v0 = vld [vmem:[%s3780_s11 + $0x128] sm:$0xff] }
 0x7f3   :  { %v1776_v59 = vpop.f32.mrf.mxu0 }
 0x7f4   :  { %v1777_v24 = vadd.f32 %v1776_v59, %v1736_v12  ;;  %v1848_v12 = vld [vmem:[%s3780_s11 + $0x118] sm:$0xff]  ;;  %v1847_v59 = vld [vmem:[%s3780_s11 + $0x110] sm:$0xff] }
 0x7f6   :  { %1799 = vrot.lane.b32.xlu0 %v1777_v24, %s2159_s6 }
 0x7f9   :  { %v1756_v18 = vpop.f32.mrf.mxu2 }
 0x7fa   :  { %v1757_v30 = vadd.f32 %v1756_v18, %v1735_v13  ;;  %v1843_v18 = vld [vmem:[%s3780_s11 + $0xf0] sm:$0xff]  ;;  %v1842_v13 = vld [vmem:[%s3780_s11 + $0xe8] sm:$0xff] }
 0x7fc   :  { %v2086_v27 = vmul.f32 -1.442695, %v1757_v30  ;;  %v1841_v30 = vld [vmem:[%s3780_s11 + $0xe0] sm:$0xff] }
 0x7fe   :  { %1858 = vrot.lane.b32.xlu0 %v1853_v23, %s2159_s6  ;;  %2138 = vpow2.f32 %v2086_v27  ;;  %v1845_v23 = vld [vmem:[%s3780_s11 + $0x100] sm:$0xff]  ;;  %v1840_v27 = vld [vmem:[%s3780_s11 + $0xd8] sm:$0xff] }
 0x804   :  { %v2139_v50 = vpop.eup %2138 }
 0x805   :  { %v1782_v32 = vadd.f32 1.0, %v2139_v50 }
 0x807   :  { %2140 = vrcp.f32 %v1782_v32  ;;  %v1794_v34 = vand.u32 2147483648, %v1782_v32  ;;  %vm1788_vm5 = vweird.f32 %v1782_v32  ;;  %v1792_v3 = vand.u32 2147483647, %v1782_v32 }
 0x809   :  { %v1795_v62 = vor.u32 1.1754944e-38, %v1794_v34  ;;  %vm1793_vm7 = vcmp.eq.f32.partialorder %v1792_v3, 8.507059e+37  ;;  %v1837_v34 = vld [vmem:[%s3780_s11 + $0xc0] sm:$0xff] }
 0x80d   :  { %v2141_v26 = vpop.eup %2140 }
 0x80e   :  { %v1784_v48 = vmul.f32 %v2141_v26, %v1782_v32  ;;  %vm1789_vm3 = vweird.f32 %v2141_v26 }
 0x80f   :  { %vm1790_vm6 = vmor %vm1788_vm5, %vm1789_vm3 }
 0x810   :  { %v1785_v60 = vsub.f32 1.0, %v1784_v48 }
 0x812   :  { %v1786_v29 = vmul.f32 %v2141_v26, %v1785_v60 }
 0x814   :  { %v1787_v20 = vadd.f32 %v2141_v26, %v1786_v29  ;;  %v1839_v29 = vld [vmem:[%s3780_s11 + $0xd0] sm:$0xff] }
 0x816   :  { %v1791_v35 = vsel %vm1790_vm6, %v2141_v26, %v1787_v20  ;;  %v1838_v20 = vld [vmem:[%s3780_s11 + $0xc8] sm:$0xff] }
 0x817   :  { %v1796_v36 = vsel %vm1793_vm7, %v1795_v62, %v1791_v35 }
 0x818   :  { %v1805_v28 = vsub.f32 1.0, %v1796_v36  ;;  %v1811_v52 = vmul.f32 %v1796_v36, %v1688_v41  ;;  %v1852_v41 = vld [vmem:[%s3780_s11 + $0x138] sm:$0xff] }
 0x819   :  { %1918 = vmatpush.msrb.mxu3 %v1852_v41 }
 0x81b   :  { %1919 = vmatpush.msrb.mxu3 %v1851_v9 }
 0x81d   :  { %1920 = vmatpush.msrb.mxu3 %v1850_v0 }
 0x81f   :  { %1921 = vmatpush.msrb.mxu3 %v1849_v11 }
 0x821   :  { %1922 = vmatpush.msrb.mxu3 %v1848_v12 }
 0x823   :  { %1923 = vmatpush.msrb.mxu3 %v1847_v59 }
 0x868   :  { %v1800_v33 = vpop.permute.xlu0 %1799 }
 0x869   :  { %v1802_v39 = vmul.f32 %v1800_v33, %v1796_v36 }
 0x86b   :  { %v1803_v40 = vadd.f32 %v1802_v39, %v1777_v24  ;;  %v1846_v24 = vld [vmem:[%s3780_s11 + $0x108] sm:$0xff]  ;;  %s2162_s11 = smov 63  }
 0x86c   :  { %1924 = vmatpush.msrb.mxu3 %v1846_v24 }
 0x86d   :  { %2142 = vtanh.f32 %v1803_v40 }
 0x86e   :  { %1925 = vmatpush.msrb.mxu3 %v1845_v23 }
 0x870   :  { %1926 = vmatpush.msrb.mxu3 %v1844_v15  ;;  %v1859_v50 = vpop.permute.xlu0 %1858 }
 0x871   :  { %v1860_v32 = vsel %vm1690_vm2, %v3614_v10, %v1859_v50 }
 0x872   :  { %1927 = vmatpush.msrb.mxu3 %v1843_v18 }
 0x873   :  { %v2143_v42 = vpop.eup %2142 }
 0x874   :  { %1807 = vrot.lane.b32.xlu2 %v2143_v42, %s2159_s6  ;;  %1928 = vmatpush.msrb.mxu3 %v1842_v13 }
 0x876   :  { %1929 = vmatpush.msrb.mxu3 %v1841_v30 }
 0x878   :  { %1930 = vmatpush.msrb.mxu3 %v1840_v27 }
 0x87a   :  { %1931 = vmatpush.msrb.mxu3 %v1839_v29 }
 0x87c   :  { %1887 = vrot.lane.b32.xlu2 %v1885_v44, %s2159_s6  ;;  %1932 = vmatpush.msrb.mxu3 %v1838_v20 }
 0x87e   :  { %1933 = vmatpush.msrb.mxu3 %v1837_v34 }
 0x8ce   :  { %v1808_v8 = vpop.permute.xlu2 %1807 }
 0x8cf   :  { %v1810_v53 = vmul.f32 %v1808_v8, %v1805_v28 }
 0x8d1   :  { %v1812_v14 = vadd.f32 %v1811_v52, %v1810_v53 }
 0x8d3   :  { %1855 = vrot.lane.b32.xlu1 %v1812_v14, %s2159_s6 }
 0x8d6   :  { %v1888_v10 = vpop.permute.xlu2 %1887 }
 0x8d7   :  { %v1889_v3 = vsel %vm1690_vm2, %v1859_v50, %v1888_v10 }
 0x8db   :  { %1914 = vrot.lane.b32.xlu1 %v1912_v5, %s2159_s6 }
 0x945   :  { %v3689_v38 = vpop.permute.xlu1 %1855 }
 0x946   :  { %2087 = vmatmul.msk.f32.vlgmr.msrb.gmra.mxu1 %vm1690_vm2, %v3689_v38 }
 0x94d   :  { %v1915_v36 = vpop.permute.xlu1 %1914 }
 0x94e   :  { %v1916_v39 = vsel %vm1690_vm2, %v1888_v10, %v1915_v36 }
 0x9c3   :  { %v1881_v26 = vpop.f32.mrf.mxu1 }
 0x9c4   :  { %v1882_v48 = vadd.f32 %v1881_v26, %v1860_v32 }
 0x9c6   :  { %v1884_v60 = vmax.f32 %v1882_v48, 0.0 }
 0x9c8   :  { %1907 = vmatmul.f32.vlgmr.msra.gmra.mxu1 %v1884_v60 }
 0xa45   :  { %v1908_v35 = vpop.f32.mrf.mxu1 }
 0xa46   :  { %v1909_v62 = vadd.f32 %v1908_v35, %v1889_v3 }
 0xa48   :  { %v1911_v33 = vmax.f32 %v1909_v62, 0.0 }
 0xa4a   :  { %1934 = vmatmul.f32.vlgmr.msrb.gmra.mxu3 %v1911_v33 }
 0xacd   :  { %v1935_v40 = vpop.f32.mrf.mxu3 }
 0xace   :  { %v1936_v42 = vadd.f32 %v1935_v40, %v1916_v39 }
 0xad0   :  { %1945 = vrot.lane.b32.xlu0 %v1936_v42, %s2160_s10 }
 0xad8   :  { %1939 = vrot.lane.b32.xlu0 %v1936_v42, %s2161_s24 }
 0xb42   :  { %v1946_v43 = vpop.permute.xlu0 %1945 }
 0xb43   :  { %v1948_v21 = vmax.f32 %v1936_v42, %v1946_v43 }
 0xb45   :  { %1953 = vrot.lane.b32.xlu2 %v1948_v21, %s2161_s24  ;;  %v1949_v28 = vsub.f32 %v1936_v42, %v1948_v21 }
 0xb47   :  { %v1950_v8 = vmul.f32 1.442695, %v1949_v28 }
 0xb4a   :  { %v1940_v45 = vpop.permute.xlu0 %1939 }
 0xb4b   :  { %vm1942_vm8 = vcmp.gt.f32.partialorder %v1936_v42, %v1940_v45 }
 0xb4c   :  { %v2088_v56 = vsel %vm1942_vm8, 1.0, %v2156_v57 }
 0xb4d   :  { %1977 = vrot.lane.b32.xlu0 %v2088_v56, %s2162_s11  ;;  %1968 = vrot.lane.b32.xlu2 %v1912_v5, %s2163_s12 }
 0xb9f   :  { %v1954_v46 = vpop.permute.xlu2 %1953 }
 0xba0   :  { %v1956_v47 = vsub.f32 %v1936_v42, %v1954_v46 }
 0xba2   :  { %v1957_v49 = vmul.f32 1.442695, %v1956_v47 }
 0xba4   :  { %2144 = vpow2.f32 %v1957_v49 }
 0xba5   :  { %2146 = vpow2.f32 %v1950_v8 }
 0xba7   :  { %v1969_v19 = vpop.permute.xlu2 %1968 }
 0xbaa   :  { %v2145_v51 = vpop.eup %2144 }
 0xbab   :  { %1960 = vrot.lane.b32.xlu1 %v2145_v51, %s2160_s10  ;;  %v2147_v52 = vpop.eup %2146 }
 0xbb3   :  { %1973 = vrot.lane.b32.xlu1 %v1936_v42, %s2159_s6 }
 0xbbf   :  { %v1978_v61 = vpop.permute.xlu0 %1977 }
 0xc1d   :  { %v1961_v53 = vpop.permute.xlu1 %1960 }
 0xc1e   :  { %v1963_v14 = vadd.f32 %v2147_v52, %v1961_v53 }
 0xc20   :  { %2148 = vlog2.f32 %v1963_v14 }
 0xc25   :  { %v1974_v22 = vpop.permute.xlu1 %1973 }
 0xc26   :  { %v2149_v57 = vpop.eup %2148  ;;  %v1984_v7 = vsel %vm1690_vm2, %v3689_v38, %v1974_v22 }
 0xc27   :  { %v1965_v44 = vmul.f32 0.6931472, %v2149_v57  ;;  %v1986_v58 = vsel %vm1985_vm4, %v1984_v7, %v1974_v22 }
 0xc28   :  { %v1988_v31 = vsel %vm1987_vm9, %v1986_v58, %v1978_v61 }
 0xc29   :  { %v1966_v54 = vadd.f32 %v1965_v44, %v1948_v21 }
 0xc2b   :  { %v1967_v55 = vsub.f32 %v1948_v21, %v1966_v54 }
 0xc2d   :  { %v1971_v37 = vadd.f32 %v1969_v19, %v1967_v55 }
 0xc2f   :  { %1981 = vrot.lane.b32.xlu2 %v1971_v37, %s2164_s25 }
 0xc89   :  { %v1982_v17 = vpop.permute.xlu2 %1981 }
 0xc8a   :  { %v1990_v63 = vsel %vm1989_vm10, %v1988_v31, %v1982_v17 }
 0xc8b   :  { %v1992_v1 = vsel %vm1991_vm11, %v1990_v63, 0.0 }
 0xc8c   :  { %1993 = vst [vmem:[%s3781_s13] sm:$0x3] %v1992_v1 }

</bundles_post_ra>
